<compile_context>
chip_gen: v7x
topology: tpu7x:2x2x1
jax: 0.10.0
libtpu: 0.0.40
codegen_flags: <defaults>
</compile_context>

<pallas_src>
import jax
import jax.numpy as jnp
from jax.experimental import pallas as pl
from jax.experimental.pallas import tpu as pltpu

HIDDEN = 256
OUT_PAD = 128          # padded lane width of the fused layer-3 matmul
OUT_ROWS = 8           # stored sublanes of the transposed output (row0=q1, row1=q2)
TM_MAX = 2048          # row-tile cap (bounds f32 intermediates for v7x 64 MiB VMEM)
VMEM_LIMIT = 48 * 1024 * 1024


def _round_up(x, m):
    return (x + m - 1) // m * m


def _choose_tm(batch):
    """Row tile: multiple of 128 (lane-dense transposed output); >=2 grid
    steps for larger batches (keeps both v7x TensorCores busy); capped at
    TM_MAX so f32 intermediates stay well inside VMEM on every generation."""
    bp128 = _round_up(max(batch, 1), 128)
    if bp128 <= 256:
        return bp128
    half = _round_up(-(-bp128 // 2), 256)
    return min(TM_MAX, half)


def critic_kernel(
    x_ref,                               # [TM, in_dim]  bf16 (state|action fused)
    w1_ref, b1_ref,                      # fused layer 1: [in_dim,512] bf16, [1,512] f32
    w2a_ref, b2a_ref,                    # head-1 layer 2: [256,256] bf16, [1,256] f32
    w2b_ref, b2b_ref,                    # head-2 layer 2: [256,256] bf16, [1,256] f32
    w3_ref, b3_ref,                      # fused layer 3: [512,128] bf16, [1,128] f32
    o_ref,                               # output: [8, TM] f32 (row0=q1, row1=q2)
):
    f32 = jnp.float32
    bf16 = jnp.bfloat16

    x = x_ref[...]

    # Layer 1, both heads fused along lanes -> [TM, 512].
    h1 = jnp.dot(x, w1_ref[...], preferred_element_type=f32) + b1_ref[...]
    h1 = jnp.maximum(h1, 0.0).astype(bf16)
    h1_a = h1[:, :HIDDEN]              # head-1 activations (lane-aligned slice)
    h1_b = h1[:, HIDDEN:]              # head-2 activations

    # Layer 2, the two heads interleaved so MXU pushes overlap bias/ReLU work.
    h2_a = jnp.dot(h1_a, w2a_ref[...], preferred_element_type=f32) + b2a_ref[...]
    h2_b = jnp.dot(h1_b, w2b_ref[...], preferred_element_type=f32) + b2b_ref[...]
    h2_a = jnp.maximum(h2_a, 0.0).astype(bf16)
    h2_b = jnp.maximum(h2_b, 0.0).astype(bf16)
    h2 = jnp.concatenate([h2_a, h2_b], axis=1)        # [TM, 512] bf16

    # Layer 3: single fused [512, 128] weight (col 0 = q1, col 1 = q2, rest 0).
    y = jnp.dot(h2, w3_ref[...], preferred_element_type=f32) + b3_ref[...]  # [TM,128]

    # Transpose (XLU) and store only 8 sublanes -> lane-dense [8, TM] f32
    # writeback: 16x fewer HBM bytes than the padded [TM, 128] store.
    yt = y.T                                          # [128, TM]
    o_ref[...] = yt[:OUT_ROWS, :]


def init_critic_params(key, state_dim, action_dim, hidden=HIDDEN):
    """Synthetic init mimicking nn.Linear's uniform(-1/sqrt(in), 1/sqrt(in)).

    Returns (q1_params, q2_params), each (w1, b1, w2, b2, w3, b3) with weights
    stored [in_features, out_features] (transposed vs PyTorch), all float32.
    """
    in_dim = state_dim + action_dim
    dims = [(in_dim, hidden), (hidden, hidden), (hidden, 1)]
    params = []
    for _head in range(2):
        head_params = []
        for (fan_in, fan_out) in dims:
            key, kw, kb = jax.random.split(key, 3)
            bound = 1.0 / (fan_in ** 0.5)
            w = jax.random.uniform(kw, (fan_in, fan_out), jnp.float32,
                                   minval=-bound, maxval=bound)
            b = jax.random.uniform(kb, (1, fan_out), jnp.float32,
                                   minval=-bound, maxval=bound)
            head_params += [w, b]
        params.append(tuple(head_params))
    return tuple(params)


def pack_critic_params(params):
    """Fuse / pad / bf16-cast the raw per-head params into the kernel layout."""
    (w11, b11, w12, b12, w13, b13), (w21, b21, w22, b22, w23, b23) = params
    bf16, f32 = jnp.bfloat16, jnp.float32

    # Layer 1: both heads concatenated along output lanes -> [in_dim, 512].
    w1 = jnp.concatenate([w11, w21], axis=1).astype(bf16)
    b1 = jnp.concatenate([b11, b21], axis=1).astype(f32)

    # Layer 3: one [512, 128] weight; q1 weights in rows :256 of col 0,
    # q2 weights in rows 256: of col 1, everything else zero.
    w3 = (jnp.zeros((2 * HIDDEN, OUT_PAD), f32)
          .at[:HIDDEN, 0].set(w13[:, 0])
          .at[HIDDEN:, 1].set(w23[:, 0])
          .astype(bf16))
    b3 = (jnp.zeros((1, OUT_PAD), f32)
          .at[0, 0].set(b13[0, 0])
          .at[0, 1].set(b23[0, 0]))

    return dict(
        w1=w1, b1=b1,
        w2a=w12.astype(bf16), b2a=b12.astype(f32),
        w2b=w22.astype(bf16), b2b=b22.astype(f32),
        w3=w3, b3=b3,
    )


def critic_forward(state, action, packed):
    """state: [B, sd], action: [B, ad] -> (q1 [B,1], q2 [B,1]), float32."""
    B, sd = state.shape
    ad = action.shape[1]
    in_dim = sd + ad

    TM = _choose_tm(B)
    Bp = _round_up(B, TM)

    # Single fused, padded bf16 input (layer-1 of both heads is one matmul).
    x = jnp.zeros((Bp, in_dim), jnp.bfloat16)
    x = x.at[:B, :sd].set(state.astype(jnp.bfloat16))
    x = x.at[:B, sd:].set(action.astype(jnp.bfloat16))

    weight_keys = ("w1", "b1", "w2a", "b2a", "w2b", "b2b", "w3", "b3")
    weight_args = [packed[k] for k in weight_keys]

    row_map = lambda i: (i, 0)      # activations: new row block each step
    const_map = lambda i: (0, 0)    # weights: same block every step -> DMA'd once
    col_map = lambda i: (0, i)      # transposed output: new lane block each step

    in_specs = ([pl.BlockSpec((TM, in_dim), row_map)]
                + [pl.BlockSpec(w.shape, const_map) for w in weight_args])

    weight_bytes = sum(int(w.size) * w.dtype.itemsize for w in weight_args)
    flops = 2 * Bp * (in_dim * 2 * HIDDEN            # fused layer 1
                      + 2 * HIDDEN * HIDDEN          # two layer-2 heads
                      + 2 * HIDDEN * OUT_PAD)        # fused (padded) layer 3
    bytes_accessed = int(x.size) * 2 + weight_bytes + OUT_ROWS * Bp * 4

    out = pl.pallas_call(
        critic_kernel,
        out_shape=jax.ShapeDtypeStruct((OUT_ROWS, Bp), jnp.float32),
        grid=(Bp // TM,),
        in_specs=in_specs,
        out_specs=pl.BlockSpec((OUT_ROWS, TM), col_map),
        compiler_params=pltpu.CompilerParams(
            dimension_semantics=("parallel",),
            vmem_limit_bytes=VMEM_LIMIT),
        cost_estimate=pl.CostEstimate(
            flops=flops, transcendentals=0, bytes_accessed=bytes_accessed),
    )(x, *weight_args)

    q1 = out[0, :B][:, None]
    q2 = out[1, :B][:, None]
    return q1, q2


def critic_forward_ref_f32(state, action, params):
    """Pure-JAX float32 reference (exact PyTorch semantics)."""
    x = jnp.concatenate([state, action], axis=1).astype(jnp.float32)
    outs = []
    for (w1, b1, w2, b2, w3, b3) in params:
        h1 = jnp.maximum(x @ w1 + b1, 0.0)
        h2 = jnp.maximum(h1 @ w2 + b2, 0.0)
        outs.append(h2 @ w3 + b3)
    return tuple(outs)


def critic_forward_ref_bf16(state, action, params):
    """Pure-JAX reference matching the kernel's bf16-weight / f32-accum numerics."""
    bf16, f32 = jnp.bfloat16, jnp.float32
    x = jnp.concatenate([state, action], axis=1).astype(bf16)
    outs = []
    for (w1, b1, w2, b2, w3, b3) in params:
        h1 = jnp.maximum(
            jnp.dot(x, w1.astype(bf16), preferred_element_type=f32) + b1, 0.0)
        h2 = jnp.maximum(
            jnp.dot(h1.astype(bf16), w2.astype(bf16),
                    preferred_element_type=f32) + b2, 0.0)
        outs.append(jnp.dot(h2.astype(bf16), w3.astype(bf16),
                            preferred_element_type=f32) + b3)
    return tuple(outs)


def _check(q1, q2, state, action, params):
    # Tight check vs a reference using the same bf16/f32-accum numerics.
    rb1, rb2 = critic_forward_ref_bf16(state, action, params)
    assert jnp.allclose(q1, rb1, atol=5e-3, rtol=5e-3), \
        float(jnp.max(jnp.abs(q1 - rb1)))
    assert jnp.allclose(q2, rb2, atol=5e-3, rtol=5e-3), \
        float(jnp.max(jnp.abs(q2 - rb2)))
    # Loose semantic check vs the full-float32 PyTorch-equivalent reference.
    rf1, rf2 = critic_forward_ref_f32(state, action, params)
    assert jnp.allclose(q1, rf1, atol=1e-1, rtol=1e-1)
    assert jnp.allclose(q2, rf2, atol=1e-1, rtol=1e-1)


if __name__ == "__main__":
    key = jax.random.PRNGKey(0)
    state_dim, action_dim, batch = 8, 4, 2

    k_params, k_state, k_action = jax.random.split(key, 3)
    params = init_critic_params(k_params, state_dim, action_dim)
    packed = pack_critic_params(params)

    forward = jax.jit(critic_forward)

    # Small-batch run (single grid step).
    state = jax.random.normal(k_state, (batch, state_dim), jnp.float32)
    action = jax.random.normal(k_action, (batch, action_dim), jnp.float32)
    q1, q2 = forward(state, action, packed)
    q1 = jax.block_until_ready(q1)
    q2 = jax.block_until_ready(q2)
    assert q1.shape == (batch, 1) and q2.shape == (batch, 1)
    _check(q1, q2, state, action, params)

    # Larger run exercising a multi-step grid (batch padded across 2 tiles).
    k_state2, k_action2 = jax.random.split(k_state)
    batch2 = 300
    state2 = jax.random.normal(k_state2, (batch2, state_dim), jnp.float32)
    action2 = jax.random.normal(k_action2, (batch2, action_dim), jnp.float32)
    q1b, q2b = forward(state2, action2, packed)
    q1b = jax.block_until_ready(q1b)
    q2b = jax.block_until_ready(q2b)
    assert q1b.shape == (batch2, 1) and q2b.shape == (batch2, 1)
    _check(q1b, q2b, state2, action2, params)

    print("KERNEL_OK")
</pallas_src>

<mosaic_0001>
module attributes {stable_mosaic.version = 11 : i64} {
  func.func @critic_kernel(%arg0: i32, %arg1: memref<128x12xbf16, #tpu.memory_space<vmem>>, %arg2: memref<12x512xbf16, #tpu.memory_space<vmem>>, %arg3: memref<1x512xf32, #tpu.memory_space<vmem>>, %arg4: memref<256x256xbf16, #tpu.memory_space<vmem>>, %arg5: memref<1x256xf32, #tpu.memory_space<vmem>>, %arg6: memref<256x256xbf16, #tpu.memory_space<vmem>>, %arg7: memref<1x256xf32, #tpu.memory_space<vmem>>, %arg8: memref<512x128xbf16, #tpu.memory_space<vmem>>, %arg9: memref<1x128xf32, #tpu.memory_space<vmem>>, %arg10: memref<8x128xf32, #tpu.memory_space<vmem>>) attributes {dimension_semantics = [#tpu.dimension_semantics<parallel>], iteration_bounds = array<i64: 1>, scalar_prefetch = 0 : i64, scratch_operands = 0 : i64, tpu.core_type = #tpu.core_type<tc>, window_params = [{transform_indices = @transform_0, window_bounds = array<i64: 128, 12>}, {pipeline_mode = #tpu.pipeline_mode<synchronous>, transform_indices = @transform_1, window_bounds = array<i64: 12, 512>}, {pipeline_mode = #tpu.pipeline_mode<synchronous>, transform_indices = @transform_2, window_bounds = array<i64: 1, 512>}, {pipeline_mode = #tpu.pipeline_mode<synchronous>, transform_indices = @transform_3, window_bounds = array<i64: 256, 256>}, {pipeline_mode = #tpu.pipeline_mode<synchronous>, transform_indices = @transform_4, window_bounds = array<i64: 1, 256>}, {pipeline_mode = #tpu.pipeline_mode<synchronous>, transform_indices = @transform_5, window_bounds = array<i64: 256, 256>}, {pipeline_mode = #tpu.pipeline_mode<synchronous>, transform_indices = @transform_6, window_bounds = array<i64: 1, 256>}, {pipeline_mode = #tpu.pipeline_mode<synchronous>, transform_indices = @transform_7, window_bounds = array<i64: 512, 128>}, {pipeline_mode = #tpu.pipeline_mode<synchronous>, transform_indices = @transform_8, window_bounds = array<i64: 1, 128>}, {transform_indices = @transform_9, window_bounds = array<i64: 8, 128>}]} {
    %c0 = arith.constant 0 : index
    %c0_0 = arith.constant 0 : index
    %0 = vector.load %arg1[%c0, %c0_0] : memref<128x12xbf16, #tpu.memory_space<vmem>>, vector<128x12xbf16>
    %c0_1 = arith.constant 0 : index
    %c0_2 = arith.constant 0 : index
    %1 = vector.load %arg2[%c0_1, %c0_2] : memref<12x512xbf16, #tpu.memory_space<vmem>>, vector<12x512xbf16>
    %cst = arith.constant dense<0.000000e+00> : vector<128x512xf32>
    %2 = tpu.matmul %0, %1, %cst {dimension_numbers = #tpu.dot_dimension_numbers<[1], [0], [0], [1], [0, 0, 1, 1], [], []>} : vector<128x12xbf16>, vector<12x512xbf16>, vector<128x512xf32> -> vector<128x512xf32>
    %c0_3 = arith.constant 0 : index
    %c0_4 = arith.constant 0 : index
    %3 = vector.load %arg3[%c0_3, %c0_4] : memref<1x512xf32, #tpu.memory_space<vmem>>, vector<1x512xf32>
    %4 = vector.broadcast %3 : vector<1x512xf32> to vector<128x512xf32>
    %5 = arith.addf %2, %4 : vector<128x512xf32>
    %cst_5 = arith.constant 0.000000e+00 : f32
    %6 = vector.broadcast %cst_5 : f32 to vector<128x512xf32>
    %7 = arith.maximumf %5, %6 : vector<128x512xf32>
    %8 = arith.truncf %7 : vector<128x512xf32> to vector<128x512xbf16>
    %9 = vector.extract_strided_slice %8 {offsets = [0, 0], sizes = [128, 256], strides = [1, 1]} : vector<128x512xbf16> to vector<128x256xbf16>
    %10 = vector.extract_strided_slice %8 {offsets = [0, 256], sizes = [128, 256], strides = [1, 1]} : vector<128x512xbf16> to vector<128x256xbf16>
    %c0_6 = arith.constant 0 : index
    %c0_7 = arith.constant 0 : index
    %11 = vector.load %arg4[%c0_6, %c0_7] : memref<256x256xbf16, #tpu.memory_space<vmem>>, vector<256x256xbf16>
    %cst_8 = arith.constant dense<0.000000e+00> : vector<128x256xf32>
    %12 = tpu.matmul %9, %11, %cst_8 {dimension_numbers = #tpu.dot_dimension_numbers<[1], [0], [0], [1], [0, 0, 1, 1], [], []>} : vector<128x256xbf16>, vector<256x256xbf16>, vector<128x256xf32> -> vector<128x256xf32>
    %c0_9 = arith.constant 0 : index
    %c0_10 = arith.constant 0 : index
    %13 = vector.load %arg5[%c0_9, %c0_10] : memref<1x256xf32, #tpu.memory_space<vmem>>, vector<1x256xf32>
    %14 = vector.broadcast %13 : vector<1x256xf32> to vector<128x256xf32>
    %15 = arith.addf %12, %14 : vector<128x256xf32>
    %c0_11 = arith.constant 0 : index
    %c0_12 = arith.constant 0 : index
    %16 = vector.load %arg6[%c0_11, %c0_12] : memref<256x256xbf16, #tpu.memory_space<vmem>>, vector<256x256xbf16>
    %cst_13 = arith.constant dense<0.000000e+00> : vector<128x256xf32>
    %17 = tpu.matmul %10, %16, %cst_13 {dimension_numbers = #tpu.dot_dimension_numbers<[1], [0], [0], [1], [0, 0, 1, 1], [], []>} : vector<128x256xbf16>, vector<256x256xbf16>, vector<128x256xf32> -> vector<128x256xf32>
    %c0_14 = arith.constant 0 : index
    %c0_15 = arith.constant 0 : index
    %18 = vector.load %arg7[%c0_14, %c0_15] : memref<1x256xf32, #tpu.memory_space<vmem>>, vector<1x256xf32>
    %19 = vector.broadcast %18 : vector<1x256xf32> to vector<128x256xf32>
    %20 = arith.addf %17, %19 : vector<128x256xf32>
    %cst_16 = arith.constant 0.000000e+00 : f32
    %21 = vector.broadcast %cst_16 : f32 to vector<128x256xf32>
    %22 = arith.maximumf %15, %21 : vector<128x256xf32>
    %23 = arith.truncf %22 : vector<128x256xf32> to vector<128x256xbf16>
    %cst_17 = arith.constant 0.000000e+00 : f32
    %24 = vector.broadcast %cst_17 : f32 to vector<128x256xf32>
    %25 = arith.maximumf %20, %24 : vector<128x256xf32>
    %26 = arith.truncf %25 : vector<128x256xf32> to vector<128x256xbf16>
    %27 = tpu.concatenate %23, %26 in 1 : vector<128x256xbf16>, vector<128x256xbf16> -> vector<128x512xbf16>
    %c0_18 = arith.constant 0 : index
    %c0_19 = arith.constant 0 : index
    %28 = vector.load %arg8[%c0_18, %c0_19] : memref<512x128xbf16, #tpu.memory_space<vmem>>, vector<512x128xbf16>
    %cst_20 = arith.constant dense<0.000000e+00> : vector<128x128xf32>
    %29 = tpu.matmul %27, %28, %cst_20 {dimension_numbers = #tpu.dot_dimension_numbers<[1], [0], [0], [1], [0, 0, 1, 1], [], []>} : vector<128x512xbf16>, vector<512x128xbf16>, vector<128x128xf32> -> vector<128x128xf32>
    %c0_21 = arith.constant 0 : index
    %c0_22 = arith.constant 0 : index
    %30 = vector.load %arg9[%c0_21, %c0_22] : memref<1x128xf32, #tpu.memory_space<vmem>>, vector<1x128xf32>
    %31 = vector.broadcast %30 : vector<1x128xf32> to vector<128x128xf32>
    %32 = arith.addf %29, %31 : vector<128x128xf32>
    %33 = tpu.transpose %32, [1, 0] : vector<128x128xf32> -> vector<128x128xf32>
    %34 = vector.extract_strided_slice %33 {offsets = [0, 0], sizes = [8, 128], strides = [1, 1]} : vector<128x128xf32> to vector<8x128xf32>
    %c0_23 = arith.constant 0 : index
    %c0_24 = arith.constant 0 : index
    %35 = vector.load %arg10[%c0_23, %c0_24] : memref<8x128xf32, #tpu.memory_space<vmem>>, vector<8x128xf32>
    tpu.vector_store %arg10[%c0_23, %c0_24], %34 {strides = array<i32>} : memref<8x128xf32, #tpu.memory_space<vmem>>, vector<8x128xf32>,
    return
  }
  func.func @transform_0(%arg0: i32) -> (i32, i32) {
    %c0_i32 = arith.constant 0 : i32
    %c0_i32_0 = arith.constant 0 : i32
    return %arg0, %c0_i32 : i32, i32
  }
  func.func @transform_1(%arg0: i32) -> (i32, i32) {
    %c0_i32 = arith.constant 0 : i32
    %c0_i32_0 = arith.constant 0 : i32
    %c0_i32_1 = arith.constant 0 : i32
    return %c0_i32, %c0_i32_0 : i32, i32
  }
  func.func @transform_2(%arg0: i32) -> (i32, i32) {
    %c0_i32 = arith.constant 0 : i32
    %c0_i32_0 = arith.constant 0 : i32
    %c0_i32_1 = arith.constant 0 : i32
    return %c0_i32, %c0_i32_0 : i32, i32
  }
  func.func @transform_3(%arg0: i32) -> (i32, i32) {
    %c0_i32 = arith.constant 0 : i32
    %c0_i32_0 = arith.constant 0 : i32
    %c0_i32_1 = arith.constant 0 : i32
    return %c0_i32, %c0_i32_0 : i32, i32
  }
  func.func @transform_4(%arg0: i32) -> (i32, i32) {
    %c0_i32 = arith.constant 0 : i32
    %c0_i32_0 = arith.constant 0 : i32
    %c0_i32_1 = arith.constant 0 : i32
    return %c0_i32, %c0_i32_0 : i32, i32
  }
  func.func @transform_5(%arg0: i32) -> (i32, i32) {
    %c0_i32 = arith.constant 0 : i32
    %c0_i32_0 = arith.constant 0 : i32
    %c0_i32_1 = arith.constant 0 : i32
    return %c0_i32, %c0_i32_0 : i32, i32
  }
  func.func @transform_6(%arg0: i32) -> (i32, i32) {
    %c0_i32 = arith.constant 0 : i32
    %c0_i32_0 = arith.constant 0 : i32
    %c0_i32_1 = arith.constant 0 : i32
    return %c0_i32, %c0_i32_0 : i32, i32
  }
  func.func @transform_7(%arg0: i32) -> (i32, i32) {
    %c0_i32 = arith.constant 0 : i32
    %c0_i32_0 = arith.constant 0 : i32
    %c0_i32_1 = arith.constant 0 : i32
    return %c0_i32, %c0_i32_0 : i32, i32
  }
  func.func @transform_8(%arg0: i32) -> (i32, i32) {
    %c0_i32 = arith.constant 0 : i32
    %c0_i32_0 = arith.constant 0 : i32
    %c0_i32_1 = arith.constant 0 : i32
    return %c0_i32, %c0_i32_0 : i32, i32
  }
  func.func @transform_9(%arg0: i32) -> (i32, i32) {
    %c0_i32 = arith.constant 0 : i32
    %c0_i32_0 = arith.constant 0 : i32
    return %c0_i32, %arg0 : i32, i32
  }
}

</mosaic_0001>

<bundles_post_ra>
// kernel: critic_forward.1
= control target key start
LH: loop header
LB: loop body
LE: loop exit
PB: predicated region body
PF: predicated region fallthrough
CT: control target
= control target key end

     0   :  { %14 = vsyncpa [#allocation3], 0  ;;  %s2589_s0 = inlined_call_operand.vmem [shape: bf16[128,12], index: 0, kind: input, shape index: {}]   ;;  %s2590_s1 = inlined_call_operand.vmem [shape: bf16[12,512], index: 1, kind: input, shape index: {}]   ;;  %s2591_s2 = inlined_call_operand.vmem [shape: f32[1,512], index: 2, kind: input, shape index: {}]   ;;  %s2592_s3 = inlined_call_operand.hbm [shape: bf16[256,256], index: 3, kind: input, shape index: {}]   ;;  %s2593_s4 = inlined_call_operand.vmem [shape: f32[1,256], index: 4, kind: input, shape index: {}]   ;;  %s2594_s5 = inlined_call_operand.hbm [shape: bf16[256,256], index: 5, kind: input, shape index: {}]   ;;  %s2595_s6 = inlined_call_operand.vmem [shape: f32[1,256], index: 6, kind: input, shape index: {}]   ;;  %s2596_s7 = inlined_call_operand.hbm [shape: bf16[512,128], index: 7, kind: input, shape index: {}]   ;;  %s2597_s8 = inlined_call_operand.vmem [shape: f32[1,128], index: 8, kind: input, shape index: {}]   ;;  %s2598_s9 = inlined_call_operand.vmem [shape: f32[8,128], index: 9, kind: output, shape index: {}]  }
   0x1   :  { %15 = vsyncpa [#allocation5], 0  ;;  %s2233_s30 = smov [#allocation4]   ;;  %s2234_s11 = smov [#allocation2]  }
   0x2   :  { %s41_s10 = sshll.u32 %s2233_s30, 4  ;;  %s27_s12 = sshll.u32 %s2234_s11, 4  ;;  %s42_s10 = int_to_ptr.vmem [resolvable:$true] %s41_s10  ;;  %s2291_s12 = int_to_ptr.vmem [resolvable:$true] %s27_s12 }
   0x3   :  { %s2163_s15 = scalar_lea.hbm %s2594_s5, 4096 }
   0x4   :  { %p2164_p0 = scmp.ne.s32.totalorder %s2594_s5, %s2163_s15  ;;  %p2167_p1 = scmp.lt.u32.totalorder %s2163_s15, %s2594_s5 }
   0x6   :  { %p2169_p2 = pnand %p2167_p1, %p2164_p0 }
   0x8   :  { %2172 = shalt.err (!%p2169_p2)
}
   0x9   :  { %s2173_s20 = scalar_lea.vmem %s42_s10, 4096  ;;  %p2178_p4 = scmp.lt.s32.totalorder %s42_s10, %s42_s10 }
   0xa   :  { %p2174_p3 = scmp.ne.s32.totalorder %s42_s10, %s2173_s20  ;;  %p2179_p5 = scmp.lt.s32.totalorder %s2173_s20, %s2173_s20 }
   0xc   :  { %p2180_p6 = por %p2179_p5, %p2178_p4 }
   0xe   :  { %p2181_p7 = pnand %p2180_p6, %p2174_p3 }
  0x10   :  { %2184 = shalt.err (!%p2181_p7)
}
  0x11   :  { %s2235_s21 = smov 128   ;;  %s2236_s22 = smov 8  }
  0x12   :  { %47 = dma.hbm_to_vmem [thread:$0]  %s2594_s5, 4096, %s42_s10, [#allocation5], %s2235_s21, %s2235_s21, %s2236_s22  }
  0x13   :  { %s2185_s27 = scalar_lea.hbm %s2592_s3, 4096 }
  0x14   :  { %p2186_p8 = scmp.ne.s32.totalorder %s2592_s3, %s2185_s27  ;;  %p2189_p9 = scmp.lt.u32.totalorder %s2185_s27, %s2592_s3 }
  0x16   :  { %p2191_p10 = pnand %p2189_p9, %p2186_p8 }
  0x18   :  { %2194 = shalt.err (!%p2191_p10)
}
  0x19   :  { %s2195_s13 = scalar_lea.vmem %s2291_s12, 4096  ;;  %p2200_p12 = scmp.lt.s32.totalorder %s2291_s12, %s2291_s12 }
  0x1a   :  { %p2196_p11 = scmp.ne.s32.totalorder %s2291_s12, %s2195_s13  ;;  %p2201_p13 = scmp.lt.s32.totalorder %s2195_s13, %s2195_s13 }
  0x1c   :  { %p2202_p0 = por %p2201_p13, %p2200_p12 }
  0x1e   :  { %p2203_p1 = pnand %p2202_p0, %p2196_p11 }
  0x20   :  { %2206 = shalt.err (!%p2203_p1)
}
  0x21   :  { %33 = dma.hbm_to_vmem [thread:$0]  %s2592_s3, 4096, %s2291_s12, [#allocation3], %s2235_s21, %s2235_s21, %s2236_s22  }
  0x22   :  { %s2237_s14 = smov [#allocation6]   ;;  %s2207_s18 = scalar_lea.hbm %s2596_s7, 4096 }
  0x23   :  { %s55_s15 = sshll.u32 %s2237_s14, 4  ;;  %p2208_p2 = scmp.ne.s32.totalorder %s2596_s7, %s2207_s18  ;;  %s56_s15 = int_to_ptr.vmem [resolvable:$true] %s55_s15 }
  0x24   :  { %p2211_p3 = scmp.lt.u32.totalorder %s2207_s18, %s2596_s7 }
  0x26   :  { %p2213_p4 = pnand %p2211_p3, %p2208_p2 }
  0x28   :  { %2216 = shalt.err (!%p2213_p4)
}
  0x29   :  { %s2217_s25 = scalar_lea.vmem %s56_s15, 4096  ;;  %p2222_p6 = scmp.lt.s32.totalorder %s56_s15, %s56_s15 }
  0x2a   :  { %p2218_p5 = scmp.ne.s32.totalorder %s56_s15, %s2217_s25  ;;  %p2223_p7 = scmp.lt.s32.totalorder %s2217_s25, %s2217_s25 }
  0x2c   :  { %p2224_p8 = por %p2223_p7, %p2222_p6 }
  0x2e   :  { %p2225_p9 = pnand %p2224_p8, %p2218_p5 }
  0x30   :  { %2228 = shalt.err (!%p2225_p9)
}
  0x31   :  { %s2238_s3 = smov 64   ;;  %s2239_s12 = smov 4  }
  0x32   :  { %61 = dma.hbm_to_vmem [thread:$0]  %s2596_s7, 4096, %s56_s15, [#allocation5], %s2238_s3, %s2238_s3, %s2239_s12  }
  0x33   :  { %2229 = dma.done.wait [#allocation3], 4096  }
  0x34   :  { %2230 = vsyncadd [#allocation3], 4294963200 }
  0x35   :  { %2231 = dma.done.wait [#allocation5], 8192  }
  0x36   :  { %2232 = vsyncadd [#allocation5], 4294959104  ;;  %v2240_v0 = vmov 0   ;;  %vm197_vm0 = vcmask 1045504   ;;  %v2027_v5 = vld [vmem:[%s2589_s0] sm:$0xff]   ;;  %vm172_vm1 = vcmask 97280  }
  0x37   :  { %242 = vmatprep.mubr.bf16.mxu0 %v2240_v0  ;;  %355 = vmatprep.mubr.bf16.mxu1 %v2240_v0  ;;  %v2021_v1 = vld [vmem:[%s2590_s1 + $0x4] ss:$16 sps:$4 sm:$0x3f]   ;;  %v2023_v2 = vld [vmem:[%s2590_s1 + $0xc] ss:$16 sps:$4 sm:$0x3f]  }
  0x38   :  { %1770 = vmatprep.subr.msk.bf16.mxu0 %vm197_vm0, %v2021_v1  ;;  %v2025_v3 = vld [vmem:[%s2590_s1] ss:$16 sps:$4 sm:$0x3f]   ;;  %v2026_v4 = vld [vmem:[%s2590_s1 + $0x8] ss:$16 sps:$4 sm:$0x3f]   ;;  %1779 = vmatprep.subr.msk.bf16.mxu1 %vm197_vm0, %v2023_v2 }
  0x39   :  { %v199_v6 = vsel %vm197_vm0, %v2025_v3, 0  ;;  %v205_v7 = vsel %vm197_vm0, %v2026_v4, 0  ;;  %v2028_v8 = vld [vmem:[%s2589_s0 + $0x8] sm:$0xff]   ;;  %v2041_v13 = vld [vmem:[#allocation2 + $0x10] ss:$8 sps:$4 sm:$0xff]   ;;  %v2031_v38 = vld [vmem:[%s2589_s0 + $0x20] sm:$0xff]  }
  0x3a   :  { %211 = vmatpush1.bf16.msra.mxu0 %v199_v6  ;;  %324 = vmatpush1.bf16.msra.mxu1 %v205_v7  ;;  %v2035_v9 = vld [vmem:[#allocation2] ss:$8 sps:$4 sm:$0xff]   ;;  %v2037_v10 = vld [vmem:[#allocation2 + $0x4] ss:$8 sps:$4 sm:$0xff]   ;;  %v2043_v14 = vld [vmem:[#allocation2 + $0x14] ss:$8 sps:$4 sm:$0xff]  }
  0x3b   :  { %v2038_v11 = vld [vmem:[#allocation4] ss:$8 sps:$4 sm:$0xff]   ;;  %v2040_v12 = vld [vmem:[#allocation4 + $0x4] ss:$8 sps:$4 sm:$0xff]   ;;  %736 = vmatprep.subr.bf16.mxu0 %v2037_v10  ;;  %v2046_v15 = vld [vmem:[#allocation4 + $0x14] ss:$8 sps:$4 sm:$0xff]  }
  0x3c   :  { %1053 = vmatprep.subr.bf16.mxu1 %v2040_v12  ;;  %v2044_v16 = vld [vmem:[#allocation4 + $0x10] ss:$8 sps:$4 sm:$0xff]   ;;  %v2049_v17 = vld [vmem:[#allocation2 + $0x24] ss:$8 sps:$4 sm:$0xff]   ;;  %v2047_v18 = vld [vmem:[#allocation2 + $0x20] ss:$8 sps:$4 sm:$0xff]  }
  0x3d   :  { %1771 = vmatmul.mubr.msk.bf16.vlgmr.msra.gmra.mrb[0].mxu0 %vm172_vm1, %v2027_v5  ;;  %1780 = vmatmul.mubr.msk.bf16.vlgmr.msra.gmra.mrb[0].mxu1 %vm172_vm1, %v2027_v5  ;;  %v2052_v19 = vld [vmem:[#allocation4 + $0x24] ss:$8 sps:$4 sm:$0xff]   ;;  %v2029_v20 = vld [vmem:[%s2589_s0 + $0x10] sm:$0xff]   ;;  %v2050_v21 = vld [vmem:[#allocation4 + $0x20] ss:$8 sps:$4 sm:$0xff]  }
  0x3e   :  { %252 = vmatprep.mubr.bf16.mxu0 %v2240_v0  ;;  %365 = vmatprep.mubr.bf16.mxu1 %v2240_v0  ;;  %v2053_v22 = vld [vmem:[#allocation2 + $0x30] ss:$8 sps:$4 sm:$0xff]   ;;  %v2055_v23 = vld [vmem:[#allocation2 + $0x34] ss:$8 sps:$4 sm:$0xff]   ;;  %v2061_v25 = vld [vmem:[#allocation2 + $0x44] ss:$8 sps:$4 sm:$0xff]  }
  0x3f   :  { %737 = vmatpush1.bf16.msra.mxu0 %v2035_v9  ;;  %1054 = vmatpush1.bf16.msra.mxu1 %v2038_v11  ;;  %v2058_v24 = vld [vmem:[#allocation4 + $0x34] ss:$8 sps:$4 sm:$0xff]   ;;  %v2056_v26 = vld [vmem:[#allocation4 + $0x30] ss:$8 sps:$4 sm:$0xff]   ;;  %v2059_v27 = vld [vmem:[#allocation2 + $0x40] ss:$8 sps:$4 sm:$0xff]  }
  0x40   :  { %738 = vmatprep.subr.bf16.mxu0 %v2043_v14  ;;  %1055 = vmatprep.subr.bf16.mxu1 %v2046_v15  ;;  %v2064_v28 = vld [vmem:[#allocation4 + $0x44] ss:$8 sps:$4 sm:$0xff]   ;;  %v2030_v29 = vld [vmem:[%s2589_s0 + $0x18] sm:$0xff]   ;;  %v2062_v30 = vld [vmem:[#allocation4 + $0x40] ss:$8 sps:$4 sm:$0xff]  }
  0x41   :  { %v2065_v31 = vld [vmem:[#allocation2 + $0x50] ss:$8 sps:$4 sm:$0xff]   ;;  %v2067_v32 = vld [vmem:[#allocation2 + $0x54] ss:$8 sps:$4 sm:$0xff]   ;;  %v2073_v34 = vld [vmem:[#allocation2 + $0x64] ss:$8 sps:$4 sm:$0xff]  }
  0x42   :  { %v2070_v33 = vld [vmem:[#allocation4 + $0x54] ss:$8 sps:$4 sm:$0xff]   ;;  %v2068_v35 = vld [vmem:[#allocation4 + $0x50] ss:$8 sps:$4 sm:$0xff]   ;;  %v2071_v36 = vld [vmem:[#allocation2 + $0x60] ss:$8 sps:$4 sm:$0xff]  }
  0x43   :  { %739 = vmatpush1.bf16.msra.mxu0 %v2041_v13  ;;  %1056 = vmatpush1.bf16.msra.mxu1 %v2044_v16  ;;  %v2076_v37 = vld [vmem:[#allocation4 + $0x64] ss:$8 sps:$4 sm:$0xff]   ;;  %v2074_v39 = vld [vmem:[#allocation4 + $0x60] ss:$8 sps:$4 sm:$0xff]   ;;  %v2077_v40 = vld [vmem:[#allocation2 + $0x70] ss:$8 sps:$4 sm:$0xff]  }
  0x44   :  { %740 = vmatprep.subr.bf16.mxu0 %v2049_v17  ;;  %1057 = vmatprep.subr.bf16.mxu1 %v2052_v19  ;;  %v2079_v41 = vld [vmem:[#allocation2 + $0x74] ss:$8 sps:$4 sm:$0xff]   ;;  %v2085_v43 = vld [vmem:[#allocation2 + $0x84] ss:$8 sps:$4 sm:$0xff]   ;;  %v2080_v44 = vld [vmem:[#allocation4 + $0x70] ss:$8 sps:$4 sm:$0xff]   ;;  %v96_v17 = vlaneseq }
  0x45   :  { %1772 = vmatmul.mubr.msk.bf16.gmra.mrb[4].mxu0 %vm172_vm1, %v2028_v8  ;;  %1781 = vmatmul.mubr.msk.bf16.gmra.mrb[4].mxu1 %vm172_vm1, %v2028_v8  ;;  %v2082_v42 = vld [vmem:[#allocation4 + $0x74] ss:$8 sps:$4 sm:$0xff]   ;;  %v2083_v45 = vld [vmem:[#allocation2 + $0x80] ss:$8 sps:$4 sm:$0xff]   ;;  %v2088_v46 = vld [vmem:[#allocation4 + $0x84] ss:$8 sps:$4 sm:$0xff]  }
  0x46   :  { %262 = vmatprep.mubr.bf16.mxu0 %v2240_v0  ;;  %375 = vmatprep.mubr.bf16.mxu1 %v2240_v0  ;;  %v2032_v47 = vld [vmem:[%s2589_s0 + $0x28] sm:$0xff]   ;;  %v2089_v49 = vld [vmem:[#allocation2 + $0x90] ss:$8 sps:$4 sm:$0xff]   ;;  %v2091_v50 = vld [vmem:[#allocation2 + $0x94] ss:$8 sps:$4 sm:$0xff]  }
  0x47   :  { %741 = vmatpush1.bf16.msra.mxu0 %v2047_v18  ;;  %1058 = vmatpush1.bf16.msra.mxu1 %v2050_v21  ;;  %v2086_v48 = vld [vmem:[#allocation4 + $0x80] ss:$8 sps:$4 sm:$0xff]   ;;  %v2094_v51 = vld [vmem:[#allocation4 + $0x94] ss:$8 sps:$4 sm:$0xff]   ;;  %v2092_v52 = vld [vmem:[#allocation4 + $0x90] ss:$8 sps:$4 sm:$0xff]  }
  0x48   :  { %742 = vmatprep.subr.bf16.mxu0 %v2055_v23  ;;  %1059 = vmatprep.subr.bf16.mxu1 %v2058_v24  ;;  %v2097_v53 = vld [vmem:[#allocation2 + $0xa4] ss:$8 sps:$4 sm:$0xff]   ;;  %v2095_v54 = vld [vmem:[#allocation2 + $0xa0] ss:$8 sps:$4 sm:$0xff]   ;;  %v2033_v56 = vld [vmem:[%s2589_s0 + $0x30] sm:$0xff]   ;;  %v97_v18 = vshrl.u32 %v96_v17, 7 }
  0x49   :  { %v2100_v55 = vld [vmem:[#allocation4 + $0xa4] ss:$8 sps:$4 sm:$0xff]   ;;  %v2098_v57 = vld [vmem:[#allocation4 + $0xa0] ss:$8 sps:$4 sm:$0xff]   ;;  %v2103_v58 = vld [vmem:[#allocation2 + $0xb4] ss:$8 sps:$4 sm:$0xff]  }
  0x4a   :  { %v2101_v59 = vld [vmem:[#allocation2 + $0xb0] ss:$8 sps:$4 sm:$0xff]   ;;  %v2106_v60 = vld [vmem:[#allocation4 + $0xb4] ss:$8 sps:$4 sm:$0xff]   ;;  %v2109_v61 = vld [vmem:[#allocation2 + $0xc4] ss:$8 sps:$4 sm:$0xff]  }
  0x4b   :  { %743 = vmatpush1.bf16.msra.mxu0 %v2053_v22  ;;  %1060 = vmatpush1.bf16.msra.mxu1 %v2056_v26  ;;  %v2104_v62 = vld [vmem:[#allocation4 + $0xb0] ss:$8 sps:$4 sm:$0xff]   ;;  %v2107_v63 = vld [vmem:[#allocation2 + $0xc0] ss:$8 sps:$4 sm:$0xff]   ;;  %v2112_v1 = vld [vmem:[#allocation4 + $0xc4] ss:$8 sps:$4 sm:$0xff]  }
  0x4c   :  { %744 = vmatprep.subr.bf16.mxu0 %v2061_v25  ;;  %1061 = vmatprep.subr.bf16.mxu1 %v2064_v28  ;;  %v2034_v2 = vld [vmem:[%s2589_s0 + $0x38] sm:$0xff]   ;;  %v2110_v4 = vld [vmem:[#allocation4 + $0xc0] ss:$8 sps:$4 sm:$0xff]   ;;  %v2121_v7 = vld [vmem:[#allocation2 + $0xe4] ss:$8 sps:$4 sm:$0xff]   ;;  %v2402_v19 = vsub.s32 0, %v97_v18 }
  0x4d   :  { %1773 = vmatmul.mubr.msk.bf16.gmra.mrb[8].mxu0 %vm172_vm1, %v2029_v20  ;;  %1782 = vmatmul.mubr.msk.bf16.gmra.mrb[8].mxu1 %vm172_vm1, %v2029_v20  ;;  %v2115_v3 = vld [vmem:[#allocation2 + $0xd4] ss:$8 sps:$4 sm:$0xff]   ;;  %v2113_v5 = vld [vmem:[#allocation2 + $0xd0] ss:$8 sps:$4 sm:$0xff]   ;;  %v2124_v8 = vld [vmem:[#allocation4 + $0xe4] ss:$8 sps:$4 sm:$0xff]  }
  0x4e   :  { %272 = vmatprep.mubr.bf16.mxu0 %v2240_v0  ;;  %385 = vmatprep.mubr.bf16.mxu1 %v2240_v0  ;;  %v2118_v6 = vld [vmem:[#allocation4 + $0xd4] ss:$8 sps:$4 sm:$0xff]   ;;  %v2119_v9 = vld [vmem:[#allocation2 + $0xe0] ss:$8 sps:$4 sm:$0xff]   ;;  %v2125_v13 = vld [vmem:[#allocation2 + $0xf0] ss:$8 sps:$4 sm:$0xff]  }
  0x4f   :  { %745 = vmatpush1.bf16.msra.mxu0 %v2059_v27  ;;  %1062 = vmatpush1.bf16.msra.mxu1 %v2062_v30  ;;  %v2122_v10 = vld [vmem:[#allocation4 + $0xe0] ss:$8 sps:$4 sm:$0xff]   ;;  %v2127_v11 = vld [vmem:[#allocation2 + $0xf4] ss:$8 sps:$4 sm:$0xff]   ;;  %v2128_v14 = vld [vmem:[#allocation4 + $0xf0] ss:$8 sps:$4 sm:$0xff]  }
  0x50   :  { %746 = vmatprep.subr.bf16.mxu0 %v2067_v32  ;;  %1063 = vmatprep.subr.bf16.mxu1 %v2070_v33  ;;  %v2130_v12 = vld [vmem:[#allocation4 + $0xf4] ss:$8 sps:$4 sm:$0xff]   ;;  %v2131_v15 = vld [vmem:[#allocation6 + $0x40] sm:$0xff]   ;;  %v106_v20 = vsub.s32 2, %v97_v18  ;;  %v2407_v22 = vsub.s32 1, %v97_v18  ;;  %v110_v23 = vsub.s32 3, %v97_v18 }
  0x51   :  { %v2133_v16 = vld [vmem:[#allocation6 + $0xc0] sm:$0xff]  }
  0x52   :  { %v94_v21 = vld [vmem:[%s2591_s2] sm:$0xf] }
  0x53   :  { %747 = vmatpush1.bf16.msra.mxu0 %v2065_v31  ;;  %1064 = vmatpush1.bf16.msra.mxu1 %v2068_v35  ;;  %v2410_v24 = vrot.slane %v94_v21, %v2402_v19  ;;  %v2412_v25 = vrot.slane %v94_v21, %v106_v20  ;;  %v2415_v26 = vrot.slane %v94_v21, %v2407_v22  ;;  %v2139_v20 = vld [vmem:[#allocation6 + $0x50] sm:$0xff]  }
  0x54   :  { %748 = vmatprep.subr.bf16.mxu0 %v2073_v34  ;;  %1065 = vmatprep.subr.bf16.mxu1 %v2076_v37  ;;  %v2417_v27 = vrot.slane %v94_v21, %v110_v23  ;;  %v2141_v21 = vld [vmem:[#allocation6 + $0xd0] sm:$0xff]  }
  0x55   :  { %1774 = vmatmul.mubr.msk.bf16.gmra.mrb[12].mxu0 %vm172_vm1, %v2030_v29  ;;  %1783 = vmatmul.mubr.msk.bf16.gmra.mrb[12].mxu1 %vm172_vm1, %v2030_v29 }
  0x56   :  { %282 = vmatprep.mubr.bf16.mxu0 %v2240_v0  ;;  %395 = vmatprep.mubr.bf16.mxu1 %v2240_v0 }
  0x57   :  { %749 = vmatpush1.bf16.msra.mxu0 %v2071_v36  ;;  %1066 = vmatpush1.bf16.msra.mxu1 %v2074_v39 }
  0x58   :  { %750 = vmatprep.subr.bf16.mxu0 %v2079_v41  ;;  %1067 = vmatprep.subr.bf16.mxu1 %v2082_v42 }
  0x5b   :  { %751 = vmatpush1.bf16.msra.mxu0 %v2077_v40  ;;  %1068 = vmatpush1.bf16.msra.mxu1 %v2080_v44 }
  0x5c   :  { %752 = vmatprep.subr.bf16.mxu0 %v2085_v43  ;;  %1069 = vmatprep.subr.bf16.mxu1 %v2088_v46 }
  0x5d   :  { %1775 = vmatmul.mubr.msk.bf16.gmra.mrb[16].mxu0 %vm172_vm1, %v2031_v38  ;;  %1784 = vmatmul.mubr.msk.bf16.gmra.mrb[16].mxu1 %vm172_vm1, %v2031_v38 }
  0x5e   :  { %292 = vmatprep.mubr.bf16.mxu0 %v2240_v0  ;;  %405 = vmatprep.mubr.bf16.mxu1 %v2240_v0 }
  0x5f   :  { %753 = vmatpush1.bf16.msra.mxu0 %v2083_v45  ;;  %1070 = vmatpush1.bf16.msra.mxu1 %v2086_v48 }
  0x60   :  { %754 = vmatprep.subr.bf16.mxu0 %v2091_v50  ;;  %1071 = vmatprep.subr.bf16.mxu1 %v2094_v51 }
  0x63   :  { %755 = vmatpush1.bf16.msra.mxu0 %v2089_v49  ;;  %1072 = vmatpush1.bf16.msra.mxu1 %v2092_v52 }
  0x64   :  { %756 = vmatprep.subr.bf16.mxu0 %v2097_v53  ;;  %1073 = vmatprep.subr.bf16.mxu1 %v2100_v55 }
  0x65   :  { %1776 = vmatmul.mubr.msk.bf16.gmra.mrb[20].mxu0 %vm172_vm1, %v2032_v47  ;;  %1785 = vmatmul.mubr.msk.bf16.gmra.mrb[20].mxu1 %vm172_vm1, %v2032_v47 }
  0x66   :  { %302 = vmatprep.mubr.bf16.mxu0 %v2240_v0  ;;  %415 = vmatprep.mubr.bf16.mxu1 %v2240_v0 }
  0x67   :  { %757 = vmatpush1.bf16.msra.mxu0 %v2095_v54  ;;  %1074 = vmatpush1.bf16.msra.mxu1 %v2098_v57 }
  0x68   :  { %758 = vmatprep.subr.bf16.mxu0 %v2103_v58  ;;  %1075 = vmatprep.subr.bf16.mxu1 %v2106_v60  ;;  %v2132_v58 = vld [vmem:[#allocation6] sm:$0xff]  }
  0x6b   :  { %759 = vmatpush1.bf16.msra.mxu0 %v2101_v59  ;;  %1076 = vmatpush1.bf16.msra.mxu1 %v2104_v62  ;;  %v2134_v59 = vld [vmem:[#allocation6 + $0x80] sm:$0xff]  }
  0x6c   :  { %760 = vmatprep.subr.bf16.mxu0 %v2109_v61  ;;  %1077 = vmatprep.subr.bf16.mxu1 %v2112_v1  ;;  %v2135_v1 = vld [vmem:[#allocation6 + $0x48] sm:$0xff]  }
  0x6d   :  { %1777 = vmatmul.mubr.msk.bf16.gmra.mrb[24].mxu0 %vm172_vm1, %v2033_v56  ;;  %1786 = vmatmul.mubr.msk.bf16.gmra.mrb[24].mxu1 %vm172_vm1, %v2033_v56 }
  0x6e   :  { %312 = vmatprep.mubr.bf16.mxu0 %v2240_v0  ;;  %425 = vmatprep.mubr.bf16.mxu1 %v2240_v0  ;;  %v2116_v0 = vld [vmem:[#allocation4 + $0xd0] ss:$8 sps:$4 sm:$0xff]  }
  0x6f   :  { %761 = vmatpush1.bf16.msra.mxu0 %v2107_v63  ;;  %1078 = vmatpush1.bf16.msra.mxu1 %v2110_v4 }
  0x70   :  { %762 = vmatprep.subr.bf16.mxu0 %v2115_v3  ;;  %1079 = vmatprep.subr.bf16.mxu1 %v2118_v6 }
  0x73   :  { %763 = vmatpush1.bf16.msra.mxu0 %v2113_v5  ;;  %1080 = vmatpush1.bf16.msra.mxu1 %v2116_v0 }
  0x74   :  { %764 = vmatprep.subr.bf16.mxu0 %v2121_v7  ;;  %1081 = vmatprep.subr.bf16.mxu1 %v2124_v8 }
  0x75   :  { %1778 = vmatmul.mubr.msk.bf16.gmra.mrb[28].mxu0 %vm172_vm1, %v2034_v2  ;;  %1787 = vmatmul.mubr.msk.bf16.gmra.mrb[28].mxu1 %vm172_vm1, %v2034_v2  ;;  %v2137_v2 = vld [vmem:[#allocation6 + $0xc8] sm:$0xff]  }
  0x77   :  { %765 = vmatpush1.bf16.msra.mxu0 %v2119_v9  ;;  %1082 = vmatpush1.bf16.msra.mxu1 %v2122_v10 }
  0x78   :  { %766 = vmatprep.subr.bf16.mxu0 %v2127_v11  ;;  %1083 = vmatprep.subr.bf16.mxu1 %v2130_v12 }
  0x7b   :  { %767 = vmatpush1.bf16.msra.mxu0 %v2125_v13  ;;  %1084 = vmatpush1.bf16.msra.mxu1 %v2128_v14  ;;  %v2136_v14 = vld [vmem:[#allocation6 + $0x8] sm:$0xff]  }
  0x7c   :  { %1885 = vmatprep.subr.bf16.mxu0 %v2131_v15  ;;  %1949 = vmatprep.subr.bf16.mxu1 %v2133_v16  ;;  %v2138_v15 = vld [vmem:[#allocation6 + $0x88] sm:$0xff]  }
 0x110   :  { %v244_v28 = vpop.f32.mrb[0].mxu0  ;;  %v357_v29 = vpop.f32.mrb[0].mxu1 }
 0x111   :  { %v245_v30 = vadd.f32 %v244_v28, %v2410_v24  ;;  %v358_v31 = vadd.f32 %v357_v29, %v2412_v25  ;;  %v246_v32 = vpop.f32.mrb[1].mxu0  ;;  %v359_v33 = vpop.f32.mrb[1].mxu1 }
 0x112   :  { %v247_v34 = vadd.f32 %v246_v32, %v2415_v26  ;;  %v360_v35 = vadd.f32 %v359_v33, %v2417_v27  ;;  %v248_v36 = vpop.f32.mrb[2].mxu0  ;;  %v361_v37 = vpop.f32.mrb[2].mxu1 }
 0x113   :  { %v438_v38 = vmax.f32 %v358_v31, 0.0  ;;  %v249_v39 = vadd.f32 %v248_v36, %v2410_v24  ;;  %v362_v40 = vadd.f32 %v361_v37, %v2412_v25  ;;  %v250_v41 = vpop.f32.mrb[3].mxu0  ;;  %v363_v42 = vpop.f32.mrb[3].mxu1  ;;  %v436_v46 = vmax.f32 %v245_v30, 0.0  ;;  %v2140_v36 = vld [vmem:[#allocation6 + $0x10] sm:$0xff]  }
 0x114   :  { %v439_v43 = vmax.f32 %v360_v35, 0.0  ;;  %v251_v44 = vadd.f32 %v250_v41, %v2415_v26  ;;  %v364_v45 = vadd.f32 %v363_v42, %v2417_v27  ;;  %v437_v49 = vmax.f32 %v247_v34, 0.0  ;;  %v2142_v37 = vld [vmem:[#allocation6 + $0x90] sm:$0xff]   ;;  %v2143_v42 = vld [vmem:[#allocation6 + $0x58] sm:$0xff]  }
 0x115   :  { %v440_v47 = vmax.f32 %v249_v39, 0.0  ;;  %v442_v48 = vmax.f32 %v362_v40, 0.0 }
 0x116   :  { %v441_v50 = vmax.f32 %v251_v44, 0.0  ;;  %v443_v51 = vmax.f32 %v364_v45, 0.0 }
 0x117   :  { %v500_v52 = vpack.c.bf16 %v440_v47, %v436_v46  ;;  %v502_v53 = vpack.c.bf16 %v442_v48, %v438_v38 }
 0x118   :  { %v501_v54 = vpack.c.bf16 %v441_v50, %v437_v49  ;;  %v503_v55 = vpack.c.bf16 %v443_v51, %v439_v43  ;;  %v254_v56 = vpop.f32.mrb[4].mxu0  ;;  %v367_v57 = vpop.f32.mrb[4].mxu1  ;;  %v2145_v43 = vld [vmem:[#allocation6 + $0xd8] sm:$0xff]  }
 0x119   :  { %v255_v60 = vadd.f32 %v254_v56, %v2410_v24  ;;  %v368_v61 = vadd.f32 %v367_v57, %v2412_v25  ;;  %v256_v62 = vpop.f32.mrb[5].mxu0  ;;  %v369_v63 = vpop.f32.mrb[5].mxu1  ;;  %v2144_v56 = vld [vmem:[#allocation6 + $0x18] sm:$0xff]  }
 0x11a   :  { %v257_v3 = vadd.f32 %v256_v62, %v2415_v26  ;;  %v370_v4 = vadd.f32 %v369_v63, %v2417_v27  ;;  %v258_v5 = vpop.f32.mrb[6].mxu0  ;;  %v371_v6 = vpop.f32.mrb[6].mxu1  ;;  %768 = vmatprep.mubr.bf16.mxu0 %v501_v54  ;;  %1085 = vmatprep.mubr.bf16.mxu1 %v503_v55  ;;  %v2146_v57 = vld [vmem:[#allocation6 + $0x98] sm:$0xff]   ;;  %v2149_v62 = vld [vmem:[#allocation6 + $0xe0] sm:$0xff]  }
 0x11b   :  { %v446_v0 = vmax.f32 %v368_v61, 0.0  ;;  %v259_v7 = vadd.f32 %v258_v5, %v2410_v24  ;;  %v372_v8 = vadd.f32 %v371_v6, %v2412_v25  ;;  %v260_v9 = vpop.f32.mrb[7].mxu0  ;;  %v373_v10 = vpop.f32.mrb[7].mxu1  ;;  %769 = vmatmul.mubr.bf16.vlgmr.msra.gmra.mrb[32].mxu0 %v500_v52  ;;  %1086 = vmatmul.mubr.bf16.vlgmr.msra.gmra.mrb[32].mxu1 %v502_v53  ;;  %v444_v16 = vmax.f32 %v255_v60, 0.0  ;;  %v2147_v61 = vld [vmem:[#allocation6 + $0x60] sm:$0xff]  }
 0x11c   :  { %v447_v11 = vmax.f32 %v370_v4, 0.0  ;;  %v261_v12 = vadd.f32 %v260_v9, %v2415_v26  ;;  %v374_v13 = vadd.f32 %v373_v10, %v2417_v27  ;;  %1886 = vmatpush3.bf16.msra.mxu0 %v2132_v58  ;;  %1950 = vmatpush3.bf16.msra.mxu1 %v2134_v59  ;;  %v445_v23 = vmax.f32 %v257_v3, 0.0  ;;  %v2150_v9 = vld [vmem:[#allocation6 + $0xa0] sm:$0xff]  }
 0x11d   :  { %v448_v17 = vmax.f32 %v259_v7, 0.0  ;;  %v450_v18 = vmax.f32 %v372_v8, 0.0  ;;  %1887 = vmatprep.subr.bf16.mxu0 %v2135_v1  ;;  %1951 = vmatprep.subr.bf16.mxu1 %v2137_v2  ;;  %v2148_v8 = vld [vmem:[#allocation6 + $0x20] sm:$0xff]  }
 0x11e   :  { %v449_v28 = vmax.f32 %v261_v12, 0.0  ;;  %v451_v29 = vmax.f32 %v374_v13, 0.0 }
 0x11f   :  { %v504_v30 = vpack.c.bf16 %v448_v17, %v444_v16  ;;  %v506_v31 = vpack.c.bf16 %v450_v18, %v446_v0 }
 0x120   :  { %v505_v32 = vpack.c.bf16 %v449_v28, %v445_v23  ;;  %v507_v33 = vpack.c.bf16 %v451_v29, %v447_v11  ;;  %v264_v34 = vpop.f32.mrb[8].mxu0  ;;  %v377_v35 = vpop.f32.mrb[8].mxu1  ;;  %1888 = vmatpush3.bf16.msra.mxu0 %v2136_v14  ;;  %1952 = vmatpush3.bf16.msra.mxu1 %v2138_v15  ;;  %v2151_v14 = vld [vmem:[#allocation6 + $0x68] sm:$0xff]  }
 0x121   :  { %v265_v38 = vadd.f32 %v264_v34, %v2410_v24  ;;  %v378_v39 = vadd.f32 %v377_v35, %v2412_v25  ;;  %v266_v40 = vpop.f32.mrb[9].mxu0  ;;  %v379_v41 = vpop.f32.mrb[9].mxu1  ;;  %1889 = vmatprep.subr.bf16.mxu0 %v2139_v20  ;;  %1953 = vmatprep.subr.bf16.mxu1 %v2141_v21  ;;  %v2153_v15 = vld [vmem:[#allocation6 + $0xe8] sm:$0xff]  }
 0x122   :  { %v267_v44 = vadd.f32 %v266_v40, %v2415_v26  ;;  %v380_v45 = vadd.f32 %v379_v41, %v2417_v27  ;;  %v268_v46 = vpop.f32.mrb[10].mxu0  ;;  %v381_v47 = vpop.f32.mrb[10].mxu1  ;;  %778 = vmatprep.mubr.bf16.mxu0 %v505_v32  ;;  %1095 = vmatprep.mubr.bf16.mxu1 %v507_v33  ;;  %v2152_v34 = vld [vmem:[#allocation6 + $0x28] sm:$0xff]   ;;  %v2157_v40 = vld [vmem:[#allocation6 + $0xf0] sm:$0xff]  }
 0x123   :  { %v454_v48 = vmax.f32 %v378_v39, 0.0  ;;  %v269_v49 = vadd.f32 %v268_v46, %v2410_v24  ;;  %v382_v50 = vadd.f32 %v381_v47, %v2412_v25  ;;  %v270_v51 = vpop.f32.mrb[11].mxu0  ;;  %v383_v52 = vpop.f32.mrb[11].mxu1  ;;  %779 = vmatmul.mubr.bf16.gmra.mrb[36].mxu0 %v504_v30  ;;  %1096 = vmatmul.mubr.bf16.gmra.mrb[36].mxu1 %v506_v31  ;;  %v452_v58 = vmax.f32 %v265_v38, 0.0  ;;  %v2154_v35 = vld [vmem:[#allocation6 + $0xa8] sm:$0xff]   ;;  %v2155_v39 = vld [vmem:[#allocation6 + $0x70] sm:$0xff]  }
 0x124   :  { %v455_v53 = vmax.f32 %v380_v45, 0.0  ;;  %v271_v54 = vadd.f32 %v270_v51, %v2415_v26  ;;  %v384_v55 = vadd.f32 %v383_v52, %v2417_v27  ;;  %1890 = vmatpush3.bf16.msra.mxu0 %v2140_v36  ;;  %1954 = vmatpush3.bf16.msra.mxu1 %v2142_v37  ;;  %v453_v63 = vmax.f32 %v267_v44, 0.0  ;;  %v2158_v51 = vld [vmem:[#allocation6 + $0xb0] sm:$0xff]  }
 0x125   :  { %v456_v59 = vmax.f32 %v269_v49, 0.0  ;;  %v458_v60 = vmax.f32 %v382_v50, 0.0  ;;  %1891 = vmatprep.subr.bf16.mxu0 %v2143_v42  ;;  %1955 = vmatprep.subr.bf16.mxu1 %v2145_v43  ;;  %v2156_v50 = vld [vmem:[#allocation6 + $0x30] sm:$0xff]  }
 0x126   :  { %v457_v1 = vmax.f32 %v271_v54, 0.0  ;;  %v459_v2 = vmax.f32 %v384_v55, 0.0 }
 0x127   :  { %v508_v3 = vpack.c.bf16 %v456_v59, %v452_v58  ;;  %v510_v4 = vpack.c.bf16 %v458_v60, %v454_v48 }
 0x128   :  { %v509_v5 = vpack.c.bf16 %v457_v1, %v453_v63  ;;  %v511_v6 = vpack.c.bf16 %v459_v2, %v455_v53  ;;  %v274_v0 = vpop.f32.mrb[12].mxu0  ;;  %v387_v7 = vpop.f32.mrb[12].mxu1  ;;  %1892 = vmatpush3.bf16.msra.mxu0 %v2144_v56  ;;  %1956 = vmatpush3.bf16.msra.mxu1 %v2146_v57 }
 0x129   :  { %v275_v10 = vadd.f32 %v274_v0, %v2410_v24  ;;  %v388_v11 = vadd.f32 %v387_v7, %v2412_v25  ;;  %v276_v12 = vpop.f32.mrb[13].mxu0  ;;  %v389_v13 = vpop.f32.mrb[13].mxu1  ;;  %1893 = vmatprep.subr.bf16.mxu0 %v2147_v61  ;;  %1957 = vmatprep.subr.bf16.mxu1 %v2149_v62 }
 0x12a   :  { %v277_v16 = vadd.f32 %v276_v12, %v2415_v26  ;;  %v390_v17 = vadd.f32 %v389_v13, %v2417_v27  ;;  %v278_v18 = vpop.f32.mrb[14].mxu0  ;;  %v391_v20 = vpop.f32.mrb[14].mxu1  ;;  %788 = vmatprep.mubr.bf16.mxu0 %v509_v5  ;;  %1105 = vmatprep.mubr.bf16.mxu1 %v511_v6 }
 0x12b   :  { %v462_v21 = vmax.f32 %v388_v11, 0.0  ;;  %v279_v23 = vadd.f32 %v278_v18, %v2410_v24  ;;  %v392_v28 = vadd.f32 %v391_v20, %v2412_v25  ;;  %v280_v29 = vpop.f32.mrb[15].mxu0  ;;  %v393_v30 = vpop.f32.mrb[15].mxu1  ;;  %789 = vmatmul.mubr.bf16.gmra.mrb[40].mxu0 %v508_v3  ;;  %1106 = vmatmul.mubr.bf16.gmra.mrb[40].mxu1 %v510_v4  ;;  %v460_v36 = vmax.f32 %v275_v10, 0.0 }
 0x12c   :  { %v463_v31 = vmax.f32 %v390_v17, 0.0  ;;  %v281_v32 = vadd.f32 %v280_v29, %v2415_v26  ;;  %v394_v33 = vadd.f32 %v393_v30, %v2417_v27  ;;  %1894 = vmatpush3.bf16.msra.mxu0 %v2148_v8  ;;  %1958 = vmatpush3.bf16.msra.mxu1 %v2150_v9  ;;  %v461_v41 = vmax.f32 %v277_v16, 0.0 }
 0x12d   :  { %v464_v37 = vmax.f32 %v279_v23, 0.0  ;;  %v466_v38 = vmax.f32 %v392_v28, 0.0  ;;  %1895 = vmatprep.subr.bf16.mxu0 %v2151_v14  ;;  %1959 = vmatprep.subr.bf16.mxu1 %v2153_v15 }
 0x12e   :  { %v465_v42 = vmax.f32 %v281_v32, 0.0  ;;  %v467_v43 = vmax.f32 %v394_v33, 0.0 }
 0x12f   :  { %v512_v44 = vpack.c.bf16 %v464_v37, %v460_v36  ;;  %v514_v45 = vpack.c.bf16 %v466_v38, %v462_v21 }
 0x130   :  { %v513_v46 = vpack.c.bf16 %v465_v42, %v461_v41  ;;  %v515_v47 = vpack.c.bf16 %v467_v43, %v463_v31  ;;  %v284_v48 = vpop.f32.mrb[16].mxu0  ;;  %v397_v49 = vpop.f32.mrb[16].mxu1  ;;  %1896 = vmatpush3.bf16.msra.mxu0 %v2152_v34  ;;  %1960 = vmatpush3.bf16.msra.mxu1 %v2154_v35 }
 0x131   :  { %v285_v52 = vadd.f32 %v284_v48, %v2410_v24  ;;  %v398_v53 = vadd.f32 %v397_v49, %v2412_v25  ;;  %v286_v54 = vpop.f32.mrb[17].mxu0  ;;  %v399_v55 = vpop.f32.mrb[17].mxu1  ;;  %1897 = vmatprep.subr.bf16.mxu0 %v2155_v39  ;;  %1961 = vmatprep.subr.bf16.mxu1 %v2157_v40 }
 0x132   :  { %v287_v56 = vadd.f32 %v286_v54, %v2415_v26  ;;  %v400_v57 = vadd.f32 %v399_v55, %v2417_v27  ;;  %v288_v58 = vpop.f32.mrb[18].mxu0  ;;  %v401_v59 = vpop.f32.mrb[18].mxu1  ;;  %798 = vmatprep.mubr.bf16.mxu0 %v513_v46  ;;  %1115 = vmatprep.mubr.bf16.mxu1 %v515_v47 }
 0x133   :  { %v470_v60 = vmax.f32 %v398_v53, 0.0  ;;  %v289_v61 = vadd.f32 %v288_v58, %v2410_v24  ;;  %v402_v62 = vadd.f32 %v401_v59, %v2412_v25  ;;  %v290_v63 = vpop.f32.mrb[19].mxu0  ;;  %v403_v1 = vpop.f32.mrb[19].mxu1  ;;  %799 = vmatmul.mubr.bf16.gmra.mrb[44].mxu0 %v512_v44  ;;  %1116 = vmatmul.mubr.bf16.gmra.mrb[44].mxu1 %v514_v45  ;;  %v468_v5 = vmax.f32 %v285_v52, 0.0 }
 0x134   :  { %v471_v2 = vmax.f32 %v400_v57, 0.0  ;;  %v291_v3 = vadd.f32 %v290_v63, %v2415_v26  ;;  %v404_v4 = vadd.f32 %v403_v1, %v2417_v27  ;;  %1898 = vmatpush3.bf16.msra.mxu0 %v2156_v50  ;;  %1962 = vmatpush3.bf16.msra.mxu1 %v2158_v51  ;;  %v469_v7 = vmax.f32 %v287_v56, 0.0 }
 0x135   :  { %v472_v6 = vmax.f32 %v289_v61, 0.0  ;;  %v474_v0 = vmax.f32 %v402_v62, 0.0 }
 0x136   :  { %v473_v8 = vmax.f32 %v291_v3, 0.0  ;;  %v475_v9 = vmax.f32 %v404_v4, 0.0 }
 0x137   :  { %v516_v10 = vpack.c.bf16 %v472_v6, %v468_v5  ;;  %v518_v11 = vpack.c.bf16 %v474_v0, %v470_v60 }
 0x138   :  { %v517_v12 = vpack.c.bf16 %v473_v8, %v469_v7  ;;  %v519_v13 = vpack.c.bf16 %v475_v9, %v471_v2  ;;  %v294_v14 = vpop.f32.mrb[20].mxu0  ;;  %v407_v15 = vpop.f32.mrb[20].mxu1 }
 0x139   :  { %v295_v16 = vadd.f32 %v294_v14, %v2410_v24  ;;  %v408_v17 = vadd.f32 %v407_v15, %v2412_v25  ;;  %v296_v18 = vpop.f32.mrb[21].mxu0  ;;  %v409_v20 = vpop.f32.mrb[21].mxu1 }
 0x13a   :  { %v297_v21 = vadd.f32 %v296_v18, %v2415_v26  ;;  %v410_v23 = vadd.f32 %v409_v20, %v2417_v27  ;;  %v298_v28 = vpop.f32.mrb[22].mxu0  ;;  %v411_v29 = vpop.f32.mrb[22].mxu1  ;;  %808 = vmatprep.mubr.bf16.mxu0 %v517_v12  ;;  %1125 = vmatprep.mubr.bf16.mxu1 %v519_v13 }
 0x13b   :  { %v478_v30 = vmax.f32 %v408_v17, 0.0  ;;  %v299_v31 = vadd.f32 %v298_v28, %v2410_v24  ;;  %v412_v32 = vadd.f32 %v411_v29, %v2412_v25  ;;  %v300_v33 = vpop.f32.mrb[23].mxu0  ;;  %v413_v34 = vpop.f32.mrb[23].mxu1  ;;  %809 = vmatmul.mubr.bf16.gmra.mrb[48].mxu0 %v516_v10  ;;  %1126 = vmatmul.mubr.bf16.gmra.mrb[48].mxu1 %v518_v11  ;;  %v476_v38 = vmax.f32 %v295_v16, 0.0 }
 0x13c   :  { %v479_v35 = vmax.f32 %v410_v23, 0.0  ;;  %v301_v36 = vadd.f32 %v300_v33, %v2415_v26  ;;  %v414_v37 = vadd.f32 %v413_v34, %v2417_v27  ;;  %v477_v41 = vmax.f32 %v297_v21, 0.0 }
 0x13d   :  { %v480_v39 = vmax.f32 %v299_v31, 0.0  ;;  %v482_v40 = vmax.f32 %v412_v32, 0.0 }
 0x13e   :  { %v481_v42 = vmax.f32 %v301_v36, 0.0  ;;  %v483_v43 = vmax.f32 %v414_v37, 0.0 }
 0x13f   :  { %v520_v44 = vpack.c.bf16 %v480_v39, %v476_v38  ;;  %v522_v45 = vpack.c.bf16 %v482_v40, %v478_v30 }
 0x140   :  { %v521_v46 = vpack.c.bf16 %v481_v42, %v477_v41  ;;  %v523_v47 = vpack.c.bf16 %v483_v43, %v479_v35  ;;  %v304_v48 = vpop.f32.mrb[24].mxu0  ;;  %v417_v49 = vpop.f32.mrb[24].mxu1 }
 0x141   :  { %v305_v50 = vadd.f32 %v304_v48, %v2410_v24  ;;  %v418_v51 = vadd.f32 %v417_v49, %v2412_v25  ;;  %v306_v52 = vpop.f32.mrb[25].mxu0  ;;  %v419_v53 = vpop.f32.mrb[25].mxu1 }
 0x142   :  { %v307_v54 = vadd.f32 %v306_v52, %v2415_v26  ;;  %v420_v55 = vadd.f32 %v419_v53, %v2417_v27  ;;  %v308_v56 = vpop.f32.mrb[26].mxu0  ;;  %v421_v57 = vpop.f32.mrb[26].mxu1  ;;  %818 = vmatprep.mubr.bf16.mxu0 %v521_v46  ;;  %1135 = vmatprep.mubr.bf16.mxu1 %v523_v47  ;;  %v2160_v46 = vld [vmem:[#allocation6 + $0x38] sm:$0xff]   ;;  %v881_v47 = vld [vmem:[%s2595_s6] sm:$0x3] }
 0x143   :  { %v486_v58 = vmax.f32 %v418_v51, 0.0  ;;  %v309_v59 = vadd.f32 %v308_v56, %v2410_v24  ;;  %v422_v60 = vadd.f32 %v421_v57, %v2412_v25  ;;  %v310_v61 = vpop.f32.mrb[27].mxu0  ;;  %v423_v62 = vpop.f32.mrb[27].mxu1  ;;  %819 = vmatmul.mubr.bf16.gmra.mrb[52].mxu0 %v520_v44  ;;  %1136 = vmatmul.mubr.bf16.gmra.mrb[52].mxu1 %v522_v45  ;;  %v484_v3 = vmax.f32 %v305_v50, 0.0  ;;  %v2161_v45 = vld [vmem:[#allocation6 + $0xf8] sm:$0xff]  }
 0x144   :  { %v487_v63 = vmax.f32 %v420_v55, 0.0  ;;  %v311_v1 = vadd.f32 %v310_v61, %v2415_v26  ;;  %v424_v2 = vadd.f32 %v423_v62, %v2417_v27  ;;  %v485_v6 = vmax.f32 %v307_v54, 0.0  ;;  %1963 = vmatprep.subr.bf16.mxu1 %v2161_v45 }
 0x145   :  { %v488_v4 = vmax.f32 %v309_v59, 0.0  ;;  %v490_v5 = vmax.f32 %v422_v60, 0.0  ;;  %v2493_v49 = vrot.slane %v881_v47, %v2402_v19  ;;  %v2499_v51 = vrot.slane %v881_v47, %v2407_v22 }
 0x146   :  { %v489_v0 = vmax.f32 %v311_v1, 0.0  ;;  %v491_v7 = vmax.f32 %v424_v2, 0.0 }
 0x147   :  { %v524_v8 = vpack.c.bf16 %v488_v4, %v484_v3  ;;  %v526_v9 = vpack.c.bf16 %v490_v5, %v486_v58 }
 0x148   :  { %v525_v10 = vpack.c.bf16 %v489_v0, %v485_v6  ;;  %v527_v11 = vpack.c.bf16 %v491_v7, %v487_v63  ;;  %v314_v12 = vpop.f32.mrb[28].mxu0  ;;  %v427_v13 = vpop.f32.mrb[28].mxu1 }
 0x149   :  { %v315_v14 = vadd.f32 %v314_v12, %v2410_v24  ;;  %v428_v15 = vadd.f32 %v427_v13, %v2412_v25  ;;  %v316_v16 = vpop.f32.mrb[29].mxu0  ;;  %v429_v17 = vpop.f32.mrb[29].mxu1 }
 0x14a   :  { %v317_v18 = vadd.f32 %v316_v16, %v2415_v26  ;;  %v430_v20 = vadd.f32 %v429_v17, %v2417_v27  ;;  %v318_v21 = vpop.f32.mrb[30].mxu0  ;;  %v431_v23 = vpop.f32.mrb[30].mxu1  ;;  %828 = vmatprep.mubr.bf16.mxu0 %v525_v10  ;;  %1145 = vmatprep.mubr.bf16.mxu1 %v527_v11 }
 0x14b   :  { %v494_v28 = vmax.f32 %v428_v15, 0.0  ;;  %v319_v29 = vadd.f32 %v318_v21, %v2410_v24  ;;  %v432_v30 = vadd.f32 %v431_v23, %v2412_v25  ;;  %v320_v31 = vpop.f32.mrb[31].mxu0  ;;  %v433_v32 = vpop.f32.mrb[31].mxu1  ;;  %829 = vmatmul.mubr.bf16.gmra.mrb[56].mxu0 %v524_v8  ;;  %1146 = vmatmul.mubr.bf16.gmra.mrb[56].mxu1 %v526_v9  ;;  %v492_v36 = vmax.f32 %v315_v14, 0.0  ;;  %v2159_v25 = vld [vmem:[#allocation6 + $0x78] sm:$0xff]  }
 0x14c   :  { %v495_v33 = vmax.f32 %v430_v20, 0.0  ;;  %v321_v34 = vadd.f32 %v320_v31, %v2415_v26  ;;  %v434_v35 = vadd.f32 %v433_v32, %v2417_v27  ;;  %v493_v39 = vmax.f32 %v317_v18, 0.0  ;;  %v2162_v26 = vld [vmem:[#allocation6 + $0xb8] sm:$0xff]   ;;  %1899 = vmatprep.subr.bf16.mxu0 %v2159_v25  ;;  %v564_v27 = vld [vmem:[%s2593_s4] sm:$0x3] }
 0x14d   :  { %v496_v37 = vmax.f32 %v319_v29, 0.0  ;;  %v498_v38 = vmax.f32 %v432_v30, 0.0  ;;  %1900 = vmatpush3.bf16.msra.mxu0 %v2160_v46  ;;  %1964 = vmatpush3.bf16.msra.mxu1 %v2162_v26  ;;  %v2490_v48 = vrot.slane %v564_v27, %v2402_v19  ;;  %v2496_v50 = vrot.slane %v564_v27, %v2407_v22 }
 0x14e   :  { %v497_v40 = vmax.f32 %v321_v34, 0.0  ;;  %v499_v41 = vmax.f32 %v434_v35, 0.0 }
 0x14f   :  { %v528_v42 = vpack.c.bf16 %v496_v37, %v492_v36  ;;  %v530_v43 = vpack.c.bf16 %v498_v38, %v494_v28 }
 0x150   :  { %v529_v24 = vpack.c.bf16 %v497_v40, %v493_v39  ;;  %v531_v44 = vpack.c.bf16 %v499_v41, %v495_v33 }
 0x152   :  { %838 = vmatprep.mubr.bf16.mxu0 %v529_v24  ;;  %1155 = vmatprep.mubr.bf16.mxu1 %v531_v44 }
 0x153   :  { %839 = vmatmul.mubr.bf16.gmra.mrb[60].mxu0 %v528_v42  ;;  %1156 = vmatmul.mubr.bf16.gmra.mrb[60].mxu1 %v530_v43 }
 0x1ee   :  { %v770_v52 = vpop.f32.mrb[32].mxu0  ;;  %v1087_v53 = vpop.f32.mrb[32].mxu1 }
 0x1ef   :  { %v771_v54 = vadd.f32 %v770_v52, %v2490_v48  ;;  %v1088_v55 = vadd.f32 %v1087_v53, %v2493_v49  ;;  %v772_v56 = vpop.f32.mrb[33].mxu0  ;;  %v1089_v57 = vpop.f32.mrb[33].mxu1 }
 0x1f0   :  { %v773_v58 = vadd.f32 %v772_v56, %v2496_v50  ;;  %v1090_v59 = vadd.f32 %v1089_v57, %v2499_v51  ;;  %v774_v19 = vpop.f32.mrb[34].mxu0  ;;  %v1091_v60 = vpop.f32.mrb[34].mxu1 }
 0x1f1   :  { %v775_v61 = vadd.f32 %v774_v19, %v2490_v48  ;;  %v1092_v62 = vadd.f32 %v1091_v60, %v2493_v49  ;;  %v776_v22 = vpop.f32.mrb[35].mxu0  ;;  %v1093_v63 = vpop.f32.mrb[35].mxu1  ;;  %v1166_v3 = vmax.f32 %v771_v54, 0.0  ;;  %v1214_v4 = vmax.f32 %v1088_v55, 0.0 }
 0x1f2   :  { %v777_v1 = vadd.f32 %v776_v22, %v2496_v50  ;;  %v1094_v2 = vadd.f32 %v1093_v63, %v2499_v51  ;;  %v1167_v0 = vmax.f32 %v773_v58, 0.0  ;;  %v1215_v7 = vmax.f32 %v1090_v59, 0.0 }
 0x1f3   :  { %v1168_v5 = vmax.f32 %v775_v61, 0.0  ;;  %v1216_v6 = vmax.f32 %v1092_v62, 0.0 }
 0x1f4   :  { %v1169_v8 = vmax.f32 %v777_v1, 0.0  ;;  %v1217_v9 = vmax.f32 %v1094_v2, 0.0 }
 0x1f5   :  { %v1198_v10 = vpack.c.bf16 %v1168_v5, %v1166_v3  ;;  %v1246_v11 = vpack.c.bf16 %v1216_v6, %v1214_v4 }
 0x1f6   :  { %v1199_v12 = vpack.c.bf16 %v1169_v8, %v1167_v0  ;;  %v1247_v13 = vpack.c.bf16 %v1217_v9, %v1215_v7  ;;  %v780_v14 = vpop.f32.mrb[36].mxu0  ;;  %v1097_v15 = vpop.f32.mrb[36].mxu1 }
 0x1f7   :  { %v781_v16 = vadd.f32 %v780_v14, %v2490_v48  ;;  %v1098_v17 = vadd.f32 %v1097_v15, %v2493_v49  ;;  %v782_v18 = vpop.f32.mrb[37].mxu0  ;;  %v1099_v20 = vpop.f32.mrb[37].mxu1 }
 0x1f8   :  { %v783_v21 = vadd.f32 %v782_v18, %v2496_v50  ;;  %v1100_v23 = vadd.f32 %v1099_v20, %v2499_v51  ;;  %v784_v28 = vpop.f32.mrb[38].mxu0  ;;  %v1101_v29 = vpop.f32.mrb[38].mxu1  ;;  %1557 = vmatprep.mubr.bf16.mxu0 %v1199_v12  ;;  %1654 = vmatprep.mubr.bf16.mxu1 %v1247_v13 }
 0x1f9   :  { %v785_v30 = vadd.f32 %v784_v28, %v2490_v48  ;;  %v1102_v31 = vadd.f32 %v1101_v29, %v2493_v49  ;;  %v786_v32 = vpop.f32.mrb[39].mxu0  ;;  %v1103_v33 = vpop.f32.mrb[39].mxu1  ;;  %1558 = vmatmul.mubr.bf16.vlgmr.msra.gmra.mrb[64].mxu0 %v1198_v10  ;;  %1655 = vmatmul.mubr.bf16.vlgmr.msra.gmra.mrb[64].mxu1 %v1246_v11  ;;  %v1170_v36 = vmax.f32 %v781_v16, 0.0  ;;  %v1218_v37 = vmax.f32 %v1098_v17, 0.0 }
 0x1fa   :  { %v787_v34 = vadd.f32 %v786_v32, %v2496_v50  ;;  %v1104_v35 = vadd.f32 %v1103_v33, %v2499_v51  ;;  %v1171_v40 = vmax.f32 %v783_v21, 0.0  ;;  %v1219_v41 = vmax.f32 %v1100_v23, 0.0 }
 0x1fb   :  { %v1172_v38 = vmax.f32 %v785_v30, 0.0  ;;  %v1220_v39 = vmax.f32 %v1102_v31, 0.0 }
 0x1fc   :  { %v1173_v42 = vmax.f32 %v787_v34, 0.0  ;;  %v1221_v43 = vmax.f32 %v1104_v35, 0.0 }
 0x1fd   :  { %v1200_v24 = vpack.c.bf16 %v1172_v38, %v1170_v36  ;;  %v1248_v44 = vpack.c.bf16 %v1220_v39, %v1218_v37 }
 0x1fe   :  { %v1201_v25 = vpack.c.bf16 %v1173_v42, %v1171_v40  ;;  %v1249_v45 = vpack.c.bf16 %v1221_v43, %v1219_v41  ;;  %v790_v46 = vpop.f32.mrb[40].mxu0  ;;  %v1107_v26 = vpop.f32.mrb[40].mxu1 }
 0x1ff   :  { %v791_v27 = vadd.f32 %v790_v46, %v2490_v48  ;;  %v1108_v47 = vadd.f32 %v1107_v26, %v2493_v49  ;;  %v792_v52 = vpop.f32.mrb[41].mxu0  ;;  %v1109_v53 = vpop.f32.mrb[41].mxu1 }
 0x200   :  { %v793_v54 = vadd.f32 %v792_v52, %v2496_v50  ;;  %v1110_v55 = vadd.f32 %v1109_v53, %v2499_v51  ;;  %v794_v56 = vpop.f32.mrb[42].mxu0  ;;  %v1111_v57 = vpop.f32.mrb[42].mxu1  ;;  %1565 = vmatprep.mubr.bf16.mxu0 %v1201_v25  ;;  %1662 = vmatprep.mubr.bf16.mxu1 %v1249_v45 }
 0x201   :  { %v795_v58 = vadd.f32 %v794_v56, %v2490_v48  ;;  %v1112_v59 = vadd.f32 %v1111_v57, %v2493_v49  ;;  %v796_v19 = vpop.f32.mrb[43].mxu0  ;;  %v1113_v60 = vpop.f32.mrb[43].mxu1  ;;  %1566 = vmatmul.mubr.bf16.gmra.mrb[68].mxu0 %v1200_v24  ;;  %1663 = vmatmul.mubr.bf16.gmra.mrb[68].mxu1 %v1248_v44  ;;  %v1174_v22 = vmax.f32 %v791_v27, 0.0  ;;  %v1222_v63 = vmax.f32 %v1108_v47, 0.0 }
 0x202   :  { %v797_v61 = vadd.f32 %v796_v19, %v2496_v50  ;;  %v1114_v62 = vadd.f32 %v1113_v60, %v2499_v51  ;;  %v1175_v3 = vmax.f32 %v793_v54, 0.0  ;;  %v1223_v4 = vmax.f32 %v1110_v55, 0.0 }
 0x203   :  { %v1176_v1 = vmax.f32 %v795_v58, 0.0  ;;  %v1224_v2 = vmax.f32 %v1112_v59, 0.0 }
 0x204   :  { %v1177_v5 = vmax.f32 %v797_v61, 0.0  ;;  %v1225_v6 = vmax.f32 %v1114_v62, 0.0 }
 0x205   :  { %v1202_v0 = vpack.c.bf16 %v1176_v1, %v1174_v22  ;;  %v1250_v7 = vpack.c.bf16 %v1224_v2, %v1222_v63 }
 0x206   :  { %v1203_v8 = vpack.c.bf16 %v1177_v5, %v1175_v3  ;;  %v1251_v9 = vpack.c.bf16 %v1225_v6, %v1223_v4  ;;  %v800_v10 = vpop.f32.mrb[44].mxu0  ;;  %v1117_v11 = vpop.f32.mrb[44].mxu1 }
 0x207   :  { %v801_v12 = vadd.f32 %v800_v10, %v2490_v48  ;;  %v1118_v13 = vadd.f32 %v1117_v11, %v2493_v49  ;;  %v802_v14 = vpop.f32.mrb[45].mxu0  ;;  %v1119_v15 = vpop.f32.mrb[45].mxu1 }
 0x208   :  { %v803_v16 = vadd.f32 %v802_v14, %v2496_v50  ;;  %v1120_v17 = vadd.f32 %v1119_v15, %v2499_v51  ;;  %v804_v18 = vpop.f32.mrb[46].mxu0  ;;  %v1121_v20 = vpop.f32.mrb[46].mxu1  ;;  %1573 = vmatprep.mubr.bf16.mxu0 %v1203_v8  ;;  %1670 = vmatprep.mubr.bf16.mxu1 %v1251_v9 }
 0x209   :  { %v805_v21 = vadd.f32 %v804_v18, %v2490_v48  ;;  %v1122_v23 = vadd.f32 %v1121_v20, %v2493_v49  ;;  %v806_v28 = vpop.f32.mrb[47].mxu0  ;;  %v1123_v29 = vpop.f32.mrb[47].mxu1  ;;  %1574 = vmatmul.mubr.bf16.gmra.mrb[72].mxu0 %v1202_v0  ;;  %1671 = vmatmul.mubr.bf16.gmra.mrb[72].mxu1 %v1250_v7  ;;  %v1178_v32 = vmax.f32 %v801_v12, 0.0  ;;  %v1226_v33 = vmax.f32 %v1118_v13, 0.0 }
 0x20a   :  { %v807_v30 = vadd.f32 %v806_v28, %v2496_v50  ;;  %v1124_v31 = vadd.f32 %v1123_v29, %v2499_v51  ;;  %v1179_v36 = vmax.f32 %v803_v16, 0.0  ;;  %v1227_v37 = vmax.f32 %v1120_v17, 0.0 }
 0x20b   :  { %v1180_v34 = vmax.f32 %v805_v21, 0.0  ;;  %v1228_v35 = vmax.f32 %v1122_v23, 0.0 }
 0x20c   :  { %v1181_v38 = vmax.f32 %v807_v30, 0.0  ;;  %v1229_v39 = vmax.f32 %v1124_v31, 0.0 }
 0x20d   :  { %v1204_v40 = vpack.c.bf16 %v1180_v34, %v1178_v32  ;;  %v1252_v41 = vpack.c.bf16 %v1228_v35, %v1226_v33 }
 0x20e   :  { %v1205_v42 = vpack.c.bf16 %v1181_v38, %v1179_v36  ;;  %v1253_v43 = vpack.c.bf16 %v1229_v39, %v1227_v37  ;;  %v810_v24 = vpop.f32.mrb[48].mxu0  ;;  %v1127_v44 = vpop.f32.mrb[48].mxu1 }
 0x20f   :  { %v811_v25 = vadd.f32 %v810_v24, %v2490_v48  ;;  %v1128_v45 = vadd.f32 %v1127_v44, %v2493_v49  ;;  %v812_v46 = vpop.f32.mrb[49].mxu0  ;;  %v1129_v26 = vpop.f32.mrb[49].mxu1 }
 0x210   :  { %v813_v27 = vadd.f32 %v812_v46, %v2496_v50  ;;  %v1130_v47 = vadd.f32 %v1129_v26, %v2499_v51  ;;  %v814_v52 = vpop.f32.mrb[50].mxu0  ;;  %v1131_v53 = vpop.f32.mrb[50].mxu1  ;;  %1581 = vmatprep.mubr.bf16.mxu0 %v1205_v42  ;;  %1678 = vmatprep.mubr.bf16.mxu1 %v1253_v43 }
 0x211   :  { %v815_v54 = vadd.f32 %v814_v52, %v2490_v48  ;;  %v1132_v55 = vadd.f32 %v1131_v53, %v2493_v49  ;;  %v816_v56 = vpop.f32.mrb[51].mxu0  ;;  %v1133_v57 = vpop.f32.mrb[51].mxu1  ;;  %1582 = vmatmul.mubr.bf16.gmra.mrb[76].mxu0 %v1204_v40  ;;  %1679 = vmatmul.mubr.bf16.gmra.mrb[76].mxu1 %v1252_v41  ;;  %v1182_v19 = vmax.f32 %v811_v25, 0.0  ;;  %v1230_v60 = vmax.f32 %v1128_v45, 0.0 }
 0x212   :  { %v817_v58 = vadd.f32 %v816_v56, %v2496_v50  ;;  %v1134_v59 = vadd.f32 %v1133_v57, %v2499_v51  ;;  %v1183_v22 = vmax.f32 %v813_v27, 0.0  ;;  %v1231_v63 = vmax.f32 %v1130_v47, 0.0 }
 0x213   :  { %v1184_v61 = vmax.f32 %v815_v54, 0.0  ;;  %v1232_v62 = vmax.f32 %v1132_v55, 0.0 }
 0x214   :  { %v1185_v1 = vmax.f32 %v817_v58, 0.0  ;;  %v1233_v2 = vmax.f32 %v1134_v59, 0.0 }
 0x215   :  { %v1206_v3 = vpack.c.bf16 %v1184_v61, %v1182_v19  ;;  %v1254_v4 = vpack.c.bf16 %v1232_v62, %v1230_v60 }
 0x216   :  { %v1207_v5 = vpack.c.bf16 %v1185_v1, %v1183_v22  ;;  %v1255_v6 = vpack.c.bf16 %v1233_v2, %v1231_v63  ;;  %v820_v0 = vpop.f32.mrb[52].mxu0  ;;  %v1137_v7 = vpop.f32.mrb[52].mxu1 }
 0x217   :  { %v821_v8 = vadd.f32 %v820_v0, %v2490_v48  ;;  %v1138_v9 = vadd.f32 %v1137_v7, %v2493_v49  ;;  %v822_v10 = vpop.f32.mrb[53].mxu0  ;;  %v1139_v11 = vpop.f32.mrb[53].mxu1 }
 0x218   :  { %v823_v12 = vadd.f32 %v822_v10, %v2496_v50  ;;  %v1140_v13 = vadd.f32 %v1139_v11, %v2499_v51  ;;  %v824_v14 = vpop.f32.mrb[54].mxu0  ;;  %v1141_v15 = vpop.f32.mrb[54].mxu1  ;;  %1589 = vmatprep.mubr.bf16.mxu0 %v1207_v5  ;;  %1686 = vmatprep.mubr.bf16.mxu1 %v1255_v6 }
 0x219   :  { %v825_v16 = vadd.f32 %v824_v14, %v2490_v48  ;;  %v1142_v17 = vadd.f32 %v1141_v15, %v2493_v49  ;;  %v826_v18 = vpop.f32.mrb[55].mxu0  ;;  %v1143_v20 = vpop.f32.mrb[55].mxu1  ;;  %1590 = vmatmul.mubr.bf16.gmra.mrb[80].mxu0 %v1206_v3  ;;  %1687 = vmatmul.mubr.bf16.gmra.mrb[80].mxu1 %v1254_v4  ;;  %v1186_v28 = vmax.f32 %v821_v8, 0.0  ;;  %v1234_v29 = vmax.f32 %v1138_v9, 0.0 }
 0x21a   :  { %v827_v21 = vadd.f32 %v826_v18, %v2496_v50  ;;  %v1144_v23 = vadd.f32 %v1143_v20, %v2499_v51  ;;  %v1187_v32 = vmax.f32 %v823_v12, 0.0  ;;  %v1235_v33 = vmax.f32 %v1140_v13, 0.0 }
 0x21b   :  { %v1188_v30 = vmax.f32 %v825_v16, 0.0  ;;  %v1236_v31 = vmax.f32 %v1142_v17, 0.0 }
 0x21c   :  { %v1189_v34 = vmax.f32 %v827_v21, 0.0  ;;  %v1237_v35 = vmax.f32 %v1144_v23, 0.0 }
 0x21d   :  { %v1208_v36 = vpack.c.bf16 %v1188_v30, %v1186_v28  ;;  %v1256_v37 = vpack.c.bf16 %v1236_v31, %v1234_v29 }
 0x21e   :  { %v1209_v38 = vpack.c.bf16 %v1189_v34, %v1187_v32  ;;  %v1257_v39 = vpack.c.bf16 %v1237_v35, %v1235_v33  ;;  %v830_v40 = vpop.f32.mrb[56].mxu0  ;;  %v1147_v41 = vpop.f32.mrb[56].mxu1 }
 0x21f   :  { %v831_v42 = vadd.f32 %v830_v40, %v2490_v48  ;;  %v1148_v43 = vadd.f32 %v1147_v41, %v2493_v49  ;;  %v832_v24 = vpop.f32.mrb[57].mxu0  ;;  %v1149_v44 = vpop.f32.mrb[57].mxu1 }
 0x220   :  { %v833_v25 = vadd.f32 %v832_v24, %v2496_v50  ;;  %v1150_v45 = vadd.f32 %v1149_v44, %v2499_v51  ;;  %v834_v46 = vpop.f32.mrb[58].mxu0  ;;  %v1151_v26 = vpop.f32.mrb[58].mxu1  ;;  %1597 = vmatprep.mubr.bf16.mxu0 %v1209_v38  ;;  %1694 = vmatprep.mubr.bf16.mxu1 %v1257_v39 }
 0x221   :  { %v835_v27 = vadd.f32 %v834_v46, %v2490_v48  ;;  %v1152_v47 = vadd.f32 %v1151_v26, %v2493_v49  ;;  %v836_v52 = vpop.f32.mrb[59].mxu0  ;;  %v1153_v53 = vpop.f32.mrb[59].mxu1  ;;  %1598 = vmatmul.mubr.bf16.gmra.mrb[84].mxu0 %v1208_v36  ;;  %1695 = vmatmul.mubr.bf16.gmra.mrb[84].mxu1 %v1256_v37  ;;  %v1190_v56 = vmax.f32 %v831_v42, 0.0  ;;  %v1238_v57 = vmax.f32 %v1148_v43, 0.0  ;;  %v2568_v36 = vld [vmem:[%s2597_s8] ss:$0 sm:$0xff] }
 0x222   :  { %v837_v54 = vadd.f32 %v836_v52, %v2496_v50  ;;  %v1154_v55 = vadd.f32 %v1153_v53, %v2499_v51  ;;  %v1191_v19 = vmax.f32 %v833_v25, 0.0  ;;  %v1239_v60 = vmax.f32 %v1150_v45, 0.0 }
 0x223   :  { %v1192_v58 = vmax.f32 %v835_v27, 0.0  ;;  %v1240_v59 = vmax.f32 %v1152_v47, 0.0 }
 0x224   :  { %v1193_v61 = vmax.f32 %v837_v54, 0.0  ;;  %v1241_v62 = vmax.f32 %v1154_v55, 0.0 }
 0x225   :  { %v1210_v22 = vpack.c.bf16 %v1192_v58, %v1190_v56  ;;  %v1258_v63 = vpack.c.bf16 %v1240_v59, %v1238_v57 }
 0x226   :  { %v1211_v1 = vpack.c.bf16 %v1193_v61, %v1191_v19  ;;  %v1259_v2 = vpack.c.bf16 %v1241_v62, %v1239_v60  ;;  %v840_v3 = vpop.f32.mrb[60].mxu0  ;;  %v1157_v4 = vpop.f32.mrb[60].mxu1 }
 0x227   :  { %v841_v5 = vadd.f32 %v840_v3, %v2490_v48  ;;  %v1158_v6 = vadd.f32 %v1157_v4, %v2493_v49  ;;  %v842_v0 = vpop.f32.mrb[61].mxu0  ;;  %v1159_v7 = vpop.f32.mrb[61].mxu1 }
 0x228   :  { %v843_v8 = vadd.f32 %v842_v0, %v2496_v50  ;;  %v1160_v9 = vadd.f32 %v1159_v7, %v2499_v51  ;;  %v844_v10 = vpop.f32.mrb[62].mxu0  ;;  %v1161_v11 = vpop.f32.mrb[62].mxu1  ;;  %1605 = vmatprep.mubr.bf16.mxu0 %v1211_v1  ;;  %1702 = vmatprep.mubr.bf16.mxu1 %v1259_v2 }
 0x229   :  { %v845_v12 = vadd.f32 %v844_v10, %v2490_v48  ;;  %v1162_v13 = vadd.f32 %v1161_v11, %v2493_v49  ;;  %v846_v14 = vpop.f32.mrb[63].mxu0  ;;  %v1163_v15 = vpop.f32.mrb[63].mxu1  ;;  %1606 = vmatmul.mubr.bf16.gmra.mrb[88].mxu0 %v1210_v22  ;;  %1703 = vmatmul.mubr.bf16.gmra.mrb[88].mxu1 %v1258_v63  ;;  %v1194_v18 = vmax.f32 %v841_v5, 0.0  ;;  %v1242_v20 = vmax.f32 %v1158_v6, 0.0 }
 0x22a   :  { %v847_v16 = vadd.f32 %v846_v14, %v2496_v50  ;;  %v1164_v17 = vadd.f32 %v1163_v15, %v2499_v51  ;;  %v1195_v28 = vmax.f32 %v843_v8, 0.0  ;;  %v1243_v29 = vmax.f32 %v1160_v9, 0.0 }
 0x22b   :  { %v1196_v21 = vmax.f32 %v845_v12, 0.0  ;;  %v1244_v23 = vmax.f32 %v1162_v13, 0.0 }
 0x22c   :  { %v1197_v30 = vmax.f32 %v847_v16, 0.0  ;;  %v1245_v31 = vmax.f32 %v1164_v17, 0.0 }
 0x22d   :  { %v1212_v32 = vpack.c.bf16 %v1196_v21, %v1194_v18  ;;  %v1260_v48 = vpack.c.bf16 %v1244_v23, %v1242_v20 }
 0x22e   :  { %v1213_v33 = vpack.c.bf16 %v1197_v30, %v1195_v28  ;;  %v1261_v49 = vpack.c.bf16 %v1245_v31, %v1243_v29 }
 0x230   :  { %1613 = vmatprep.mubr.bf16.mxu0 %v1213_v33  ;;  %1710 = vmatprep.mubr.bf16.mxu1 %v1261_v49 }
 0x231   :  { %1614 = vmatmul.mubr.bf16.gmra.mrb[92].mxu0 %v1212_v32  ;;  %1711 = vmatmul.mubr.bf16.gmra.mrb[92].mxu1 %v1260_v48 }
 0x2cc   :  { %v1901_v34 = vpop.f32.mrb[64].mxu0  ;;  %v1965_v50 = vpop.f32.mrb[64].mxu1 }
 0x2cd   :  { %v1902_v35 = vpop.f32.mrb[65].mxu0  ;;  %v1966_v51 = vpop.f32.mrb[65].mxu1 }
 0x2ce   :  { %v1903_v37 = vadd.f32 %v1902_v35, %v1901_v34  ;;  %v1967_v38 = vadd.f32 %v1966_v51, %v1965_v50  ;;  %v1904_v39 = vpop.f32.mrb[66].mxu0  ;;  %v1968_v40 = vpop.f32.mrb[66].mxu1 }
 0x2cf   :  { %v1905_v41 = vpop.f32.mrb[67].mxu0  ;;  %v1969_v42 = vpop.f32.mrb[67].mxu1 }
 0x2d0   :  { %v1906_v43 = vadd.f32 %v1905_v41, %v1904_v39  ;;  %v1970_v24 = vadd.f32 %v1969_v42, %v1968_v40  ;;  %v1560_v44 = vadd.f32 %v1903_v37, %v2568_v36 }
 0x2d2   :  { %v1563_v25 = vadd.f32 %v1906_v43, %v2568_v36  ;;  %v1657_v45 = vadd.f32 %v1967_v38, %v1560_v44 }
 0x2d4   :  { %v1907_v46 = vpop.f32.mrb[68].mxu0  ;;  %v1971_v26 = vpop.f32.mrb[68].mxu1  ;;  %1719 = vxpose.xlu0.b32.start [1/16] (narrow) %v1657_v45, 8  ;;  %v1660_v27 = vadd.f32 %v1970_v24, %v1563_v25 }
 0x2d5   :  { %v1908_v47 = vpop.f32.mrb[69].mxu0  ;;  %v1972_v52 = vpop.f32.mrb[69].mxu1 }
 0x2d6   :  { %v1909_v53 = vadd.f32 %v1908_v47, %v1907_v46  ;;  %v1973_v54 = vadd.f32 %v1972_v52, %v1971_v26  ;;  %v1910_v55 = vpop.f32.mrb[70].mxu0  ;;  %v1974_v56 = vpop.f32.mrb[70].mxu1 }
 0x2d7   :  { %v1911_v57 = vpop.f32.mrb[71].mxu0  ;;  %v1975_v58 = vpop.f32.mrb[71].mxu1 }
 0x2d8   :  { %v1568_v59 = vadd.f32 %v1909_v53, %v2568_v36  ;;  %v1912_v19 = vadd.f32 %v1911_v57, %v1910_v55  ;;  %v1976_v60 = vadd.f32 %v1975_v58, %v1974_v56  ;;  %1720 = vxpose.xlu0.b32.cont [2/16] (narrow) %v1660_v27, 8 }
 0x2da   :  { %v1571_v61 = vadd.f32 %v1912_v19, %v2568_v36  ;;  %v1665_v62 = vadd.f32 %v1973_v54, %v1568_v59 }
 0x2dc   :  { %v1913_v22 = vpop.f32.mrb[72].mxu0  ;;  %v1977_v63 = vpop.f32.mrb[72].mxu1  ;;  %1721 = vxpose.xlu0.b32.cont [3/16] (narrow) %v1665_v62, 8  ;;  %v1668_v1 = vadd.f32 %v1976_v60, %v1571_v61 }
 0x2dd   :  { %v1914_v2 = vpop.f32.mrb[73].mxu0  ;;  %v1978_v3 = vpop.f32.mrb[73].mxu1 }
 0x2de   :  { %v1915_v4 = vadd.f32 %v1914_v2, %v1913_v22  ;;  %v1979_v5 = vadd.f32 %v1978_v3, %v1977_v63  ;;  %v1916_v6 = vpop.f32.mrb[74].mxu0  ;;  %v1980_v0 = vpop.f32.mrb[74].mxu1 }
 0x2df   :  { %v1917_v7 = vpop.f32.mrb[75].mxu0  ;;  %v1981_v8 = vpop.f32.mrb[75].mxu1 }
 0x2e0   :  { %v1576_v9 = vadd.f32 %v1915_v4, %v2568_v36  ;;  %v1918_v10 = vadd.f32 %v1917_v7, %v1916_v6  ;;  %v1982_v11 = vadd.f32 %v1981_v8, %v1980_v0  ;;  %1722 = vxpose.xlu0.b32.cont [4/16] (narrow) %v1668_v1, 8 }
 0x2e2   :  { %v1579_v12 = vadd.f32 %v1918_v10, %v2568_v36  ;;  %v1673_v13 = vadd.f32 %v1979_v5, %v1576_v9 }
 0x2e4   :  { %v1919_v14 = vpop.f32.mrb[76].mxu0  ;;  %v1983_v15 = vpop.f32.mrb[76].mxu1  ;;  %1723 = vxpose.xlu0.b32.cont [5/16] (narrow) %v1673_v13, 8  ;;  %v1676_v16 = vadd.f32 %v1982_v11, %v1579_v12 }
 0x2e5   :  { %v1920_v17 = vpop.f32.mrb[77].mxu0  ;;  %v1984_v18 = vpop.f32.mrb[77].mxu1 }
 0x2e6   :  { %v1921_v20 = vadd.f32 %v1920_v17, %v1919_v14  ;;  %v1985_v21 = vadd.f32 %v1984_v18, %v1983_v15  ;;  %v1922_v23 = vpop.f32.mrb[78].mxu0  ;;  %v1986_v28 = vpop.f32.mrb[78].mxu1 }
 0x2e7   :  { %v1923_v29 = vpop.f32.mrb[79].mxu0  ;;  %v1987_v30 = vpop.f32.mrb[79].mxu1 }
 0x2e8   :  { %v1584_v31 = vadd.f32 %v1921_v20, %v2568_v36  ;;  %v1924_v32 = vadd.f32 %v1923_v29, %v1922_v23  ;;  %v1988_v48 = vadd.f32 %v1987_v30, %v1986_v28  ;;  %1724 = vxpose.xlu0.b32.cont [6/16] (narrow) %v1676_v16, 8 }
 0x2ea   :  { %v1587_v33 = vadd.f32 %v1924_v32, %v2568_v36  ;;  %v1681_v49 = vadd.f32 %v1985_v21, %v1584_v31 }
 0x2ec   :  { %v1925_v34 = vpop.f32.mrb[80].mxu0  ;;  %v1989_v50 = vpop.f32.mrb[80].mxu1  ;;  %1725 = vxpose.xlu0.b32.cont [7/16] (narrow) %v1681_v49, 8  ;;  %v1684_v35 = vadd.f32 %v1988_v48, %v1587_v33 }
 0x2ed   :  { %v1926_v51 = vpop.f32.mrb[81].mxu0  ;;  %v1990_v37 = vpop.f32.mrb[81].mxu1 }
 0x2ee   :  { %v1927_v38 = vadd.f32 %v1926_v51, %v1925_v34  ;;  %v1991_v39 = vadd.f32 %v1990_v37, %v1989_v50  ;;  %v1928_v40 = vpop.f32.mrb[82].mxu0  ;;  %v1992_v41 = vpop.f32.mrb[82].mxu1 }
 0x2ef   :  { %v1929_v42 = vpop.f32.mrb[83].mxu0  ;;  %v1993_v43 = vpop.f32.mrb[83].mxu1 }
 0x2f0   :  { %v1592_v24 = vadd.f32 %v1927_v38, %v2568_v36  ;;  %v1930_v44 = vadd.f32 %v1929_v42, %v1928_v40  ;;  %v1994_v25 = vadd.f32 %v1993_v43, %v1992_v41  ;;  %1726 = vxpose.xlu0.b32.cont [8/16] (narrow) %v1684_v35, 8 }
 0x2f2   :  { %v1595_v45 = vadd.f32 %v1930_v44, %v2568_v36  ;;  %v1689_v46 = vadd.f32 %v1991_v39, %v1592_v24 }
 0x2f4   :  { %v1931_v26 = vpop.f32.mrb[84].mxu0  ;;  %v1995_v27 = vpop.f32.mrb[84].mxu1  ;;  %1727 = vxpose.xlu0.b32.cont [9/16] (narrow) %v1689_v46, 8  ;;  %v1692_v47 = vadd.f32 %v1994_v25, %v1595_v45 }
 0x2f5   :  { %v1932_v52 = vpop.f32.mrb[85].mxu0  ;;  %v1996_v53 = vpop.f32.mrb[85].mxu1 }
 0x2f6   :  { %v1933_v54 = vadd.f32 %v1932_v52, %v1931_v26  ;;  %v1997_v55 = vadd.f32 %v1996_v53, %v1995_v27  ;;  %v1934_v56 = vpop.f32.mrb[86].mxu0  ;;  %v1998_v57 = vpop.f32.mrb[86].mxu1 }
 0x2f7   :  { %v1935_v58 = vpop.f32.mrb[87].mxu0  ;;  %v1999_v59 = vpop.f32.mrb[87].mxu1 }
 0x2f8   :  { %v1600_v19 = vadd.f32 %v1933_v54, %v2568_v36  ;;  %v1936_v60 = vadd.f32 %v1935_v58, %v1934_v56  ;;  %v2000_v61 = vadd.f32 %v1999_v59, %v1998_v57  ;;  %1728 = vxpose.xlu0.b32.cont [10/16] (narrow) %v1692_v47, 8 }
 0x2fa   :  { %v1603_v62 = vadd.f32 %v1936_v60, %v2568_v36  ;;  %v1697_v22 = vadd.f32 %v1997_v55, %v1600_v19 }
 0x2fc   :  { %v1937_v63 = vpop.f32.mrb[88].mxu0  ;;  %v2001_v1 = vpop.f32.mrb[88].mxu1  ;;  %1729 = vxpose.xlu0.b32.cont [11/16] (narrow) %v1697_v22, 8  ;;  %v1700_v2 = vadd.f32 %v2000_v61, %v1603_v62 }
 0x2fd   :  { %v1938_v3 = vpop.f32.mrb[89].mxu0  ;;  %v2002_v4 = vpop.f32.mrb[89].mxu1 }
 0x2fe   :  { %v1939_v5 = vadd.f32 %v1938_v3, %v1937_v63  ;;  %v2003_v6 = vadd.f32 %v2002_v4, %v2001_v1  ;;  %v1940_v0 = vpop.f32.mrb[90].mxu0  ;;  %v2004_v7 = vpop.f32.mrb[90].mxu1 }
 0x2ff   :  { %v1941_v8 = vpop.f32.mrb[91].mxu0  ;;  %v2005_v9 = vpop.f32.mrb[91].mxu1 }
 0x300   :  { %v1608_v10 = vadd.f32 %v1939_v5, %v2568_v36  ;;  %v1942_v11 = vadd.f32 %v1941_v8, %v1940_v0  ;;  %v2006_v12 = vadd.f32 %v2005_v9, %v2004_v7  ;;  %1730 = vxpose.xlu0.b32.cont [12/16] (narrow) %v1700_v2, 8 }
 0x302   :  { %v1611_v13 = vadd.f32 %v1942_v11, %v2568_v36  ;;  %v1705_v14 = vadd.f32 %v2003_v6, %v1608_v10 }
 0x304   :  { %v1943_v15 = vpop.f32.mrb[92].mxu0  ;;  %v2007_v16 = vpop.f32.mrb[92].mxu1  ;;  %1731 = vxpose.xlu0.b32.cont [13/16] (narrow) %v1705_v14, 8  ;;  %v1708_v17 = vadd.f32 %v2006_v12, %v1611_v13 }
 0x305   :  { %v1944_v18 = vpop.f32.mrb[93].mxu0  ;;  %v2008_v20 = vpop.f32.mrb[93].mxu1 }
 0x306   :  { %v1945_v21 = vadd.f32 %v1944_v18, %v1943_v15  ;;  %v2009_v23 = vadd.f32 %v2008_v20, %v2007_v16  ;;  %v1946_v28 = vpop.f32.mrb[94].mxu0  ;;  %v2010_v29 = vpop.f32.mrb[94].mxu1 }
 0x307   :  { %v1947_v30 = vpop.f32.mrb[95].mxu0  ;;  %v2011_v31 = vpop.f32.mrb[95].mxu1 }
 0x308   :  { %v1616_v32 = vadd.f32 %v1945_v21, %v2568_v36  ;;  %v1948_v48 = vadd.f32 %v1947_v30, %v1946_v28  ;;  %v2012_v33 = vadd.f32 %v2011_v31, %v2010_v29  ;;  %1732 = vxpose.xlu0.b32.cont [14/16] (narrow) %v1708_v17, 8 }
 0x30a   :  { %v1619_v49 = vadd.f32 %v1948_v48, %v2568_v36  ;;  %v1713_v34 = vadd.f32 %v2009_v23, %v1616_v32 }
 0x30c   :  { %1733 = vxpose.xlu0.b32.cont [15/16] (narrow) %v1713_v34, 8  ;;  %v1716_v50 = vadd.f32 %v2012_v33, %v1619_v49 }
 0x310   :  { %1734 = vxpose.xlu0.b32.end [16/16] (narrow) %v1716_v50, 8 }
 0x354   :  { %v1735_v35 = vpop.trf.xlu0 }
 0x355   :  { %1751 = vst [vmem:[%s2598_s9] sm:$0xff] %v1735_v35 }
 0x356   :  { %1756 = vsyncpa [#allocation3], 1 }
 0x357   :  { %1757 = vsyncpa [#allocation5], 1 }

</bundles_post_ra>
